<compile_context>
chip_gen: v5e
topology: v5e:2x2
jax: 0.10.0
libtpu: 0.0.40
codegen_flags: <defaults>
</compile_context>

<pallas_src>
import functools

import jax
import jax.numpy as jnp
from jax.experimental import pallas as pl
from jax.experimental.pallas import tpu as pltpu

P_DROP = 0.2                         # nn.Dropout(p=0.2)
DROP_SCALE = 1.0 / (1.0 - P_DROP)    # inverted-dropout scale (Python float)

H1, H2 = 256, 128
H3_PAD = 128        # fc3 output padded 64 -> 128 lanes (zero pad)
OUT_PAD = 128       # fc4 output padded 10 -> 128 lanes
NUM_CLASSES = 10
NEG_BIG = -1e30     # bias for padded logits (ignored by log_softmax)
MASK_W = H1 + H2 + H3_PAD   # 512 B/row packed int8 keep-mask


def _dropout(h, keep_i8):
    """Train-mode inverted dropout: keep_i8 is a 0/1 int8 mask."""
    return h * (keep_i8.astype(h.dtype) * DROP_SCALE)


def _mlp_kernel(*refs, training):
    if training:
        (x_ref, mask_ref, w1_ref, b1_ref, w2_ref, b2_ref,
         w3_ref, b3_ref, w4_ref, b4_ref, out_ref) = refs
    else:
        (x_ref, w1_ref, b1_ref, w2_ref, b2_ref,
         w3_ref, b3_ref, w4_ref, b4_ref, out_ref) = refs

    def dense(h_bf16, w_ref, b_ref):
        # bf16 x bf16 -> f32 accumulation on the MXU, f32 bias add on the VPU.
        return jnp.dot(h_bf16, w_ref[...],
                       preferred_element_type=jnp.float32) + b_ref[...]

    # fc1 -> relu -> dropout (x tile arrives f32, cast to bf16 in-kernel)
    x = x_ref[...].astype(jnp.bfloat16)
    h = jnp.maximum(dense(x, w1_ref, b1_ref), 0.0)
    if training:
        h = _dropout(h, mask_ref[:, 0:H1])
    # fc2 -> relu -> dropout
    h = jnp.maximum(dense(h.astype(jnp.bfloat16), w2_ref, b2_ref), 0.0)
    if training:
        h = _dropout(h, mask_ref[:, H1:H1 + H2])
    # fc3 -> relu -> dropout (padded 64->128; padded lanes are exactly zero,
    # so masking them is a no-op)
    h = jnp.maximum(dense(h.astype(jnp.bfloat16), w3_ref, b3_ref), 0.0)
    if training:
        h = _dropout(h, mask_ref[:, H1 + H2:MASK_W])
    # fc4 (padded 10->128, padded bias = -1e30) -> log_softmax(dim=1)
    logits = dense(h.astype(jnp.bfloat16), w4_ref, b4_ref)
    m = jnp.max(logits, axis=1, keepdims=True)
    s = logits - m
    lse = jnp.log(jnp.sum(jnp.exp(s), axis=1, keepdims=True))
    out_ref[...] = s - lse


def _round_up(n, m):
    return (n + m - 1) // m * m


def classifier_forward(x, params, key, training=True):
    """Pallas equivalent of Classifier.forward.

    x: (B, 1, 28, 28) float32 (NCHW).  Returns (B, 10) log-probabilities.
    """
    B = x.shape[0]
    w1, b1, w2, b2, w3, b3, w4, b4 = params

    # --- pad narrow tail layers to full 128-lane tiles -----------------------
    w3p = jnp.pad(w3, ((0, 0), (0, H3_PAD - w3.shape[1])))
    b3p = jnp.pad(b3, (0, H3_PAD - b3.shape[0]))
    w4p = jnp.pad(w4, ((0, H3_PAD - w4.shape[0]), (0, OUT_PAD - w4.shape[1])))
    b4p = jnp.pad(b4, (0, OUT_PAD - b4.shape[0]), constant_values=NEG_BIG)

    weights = [w.astype(jnp.bfloat16) for w in (w1, w2, w3p, w4p)]
    biases = [b.reshape(1, -1).astype(jnp.float32) for b in (b1, b2, b3p, b4p)]

    # --- batch tiling ---------------------------------------------------------
    # cdiv(B, 2) keeps >=2 grid steps for big batches (v7x: 2 TensorCores on
    # the "parallel" axis); multiple of 32 satisfies int8-mask sublane tiling;
    # 1024-row cap keeps double-buffered tiles well inside VMEM.
    TB = min(1024, _round_up(max(pl.cdiv(B, 2), 1), 32))
    B_pad = _round_up(B, TB)
    n_tiles = B_pad // TB

    x2d = x.reshape(B, -1)              # x.view(B, -1): free, stays f32
    if B_pad != B:
        x2d = jnp.pad(x2d, ((0, B_pad - B), (0, 0)))
    f_in = x2d.shape[1]

    inputs = [x2d]
    in_specs = [pl.BlockSpec((TB, f_in), lambda i: (i, 0))]

    if training:
        # Single packed int8 keep-mask (1 byte per feature) generated host-side
        # with exact keep probability 1-p; each batch tile reads its own slice.
        keep = jax.random.bernoulli(key, p=1.0 - P_DROP, shape=(B_pad, MASK_W))
        inputs.append(keep.astype(jnp.int8))
        in_specs.append(pl.BlockSpec((TB, MASK_W), lambda i: (i, 0)))

    for w, b in zip(weights, biases):
        inputs += [w, b]
        # Constant index_map -> stays VMEM-resident, not re-DMA'd per step.
        in_specs += [pl.BlockSpec(w.shape, lambda i: (0, 0)),
                     pl.BlockSpec(b.shape, lambda i: (0, 0))]

    flops = 2 * B_pad * (f_in * H1 + H1 * H2 + H2 * H3_PAD + H3_PAD * OUT_PAD)
    bytes_accessed = (sum(int(a.size) * a.dtype.itemsize for a in inputs)
                      + B_pad * OUT_PAD * 4)

    out = pl.pallas_call(
        functools.partial(_mlp_kernel, training=training),
        out_shape=jax.ShapeDtypeStruct((B_pad, OUT_PAD), jnp.float32),
        grid=(n_tiles,),
        in_specs=in_specs,
        out_specs=pl.BlockSpec((TB, OUT_PAD), lambda i: (i, 0)),
        compiler_params=pltpu.CompilerParams(
            dimension_semantics=("parallel",),
            vmem_limit_bytes=48 * 1024 * 1024),
        cost_estimate=pl.CostEstimate(
            flops=flops,
            transcendentals=B_pad * OUT_PAD,
            bytes_accessed=bytes_accessed),
    )(*inputs)

    return out[:B, :NUM_CLASSES]


def _reference_eval(x, params):
    """Pure-JAX eval-mode reference (same bf16 casts as the kernel)."""
    w1, b1, w2, b2, w3, b3, w4, b4 = params
    h = x.reshape(x.shape[0], -1)
    for w, b in ((w1, b1), (w2, b2), (w3, b3)):
        h = jnp.maximum(
            jnp.dot(h.astype(jnp.bfloat16), w.astype(jnp.bfloat16),
                    preferred_element_type=jnp.float32) + b, 0.0)
    logits = jnp.dot(h.astype(jnp.bfloat16), w4.astype(jnp.bfloat16),
                     preferred_element_type=jnp.float32) + b4
    return jax.nn.log_softmax(logits, axis=1)


def init_params(key):
    """Deterministic init matching nn.Linear default (U[-1/sqrt(fan_in), +])."""
    dims = [784, 256, 128, 64, 10]
    params = []
    for i in range(4):
        key, kw, kb = jax.random.split(key, 3)
        bound = float(dims[i]) ** -0.5
        # Stored as (in, out) == transpose of PyTorch's (out, in) weight.
        w = jax.random.uniform(kw, (dims[i], dims[i + 1]), jnp.float32,
                               minval=-bound, maxval=bound)
        b = jax.random.uniform(kb, (dims[i + 1],), jnp.float32,
                               minval=-bound, maxval=bound)
        params += [w, b]
    return params


if __name__ == "__main__":
    root = jax.random.PRNGKey(0)
    k_params, k_x, k_drop = jax.random.split(root, 3)

    params = init_params(k_params)
    # Small MNIST-like batch: batch=2, NCHW (2, 1, 28, 28) -> 784 features.
    x = jax.random.normal(k_x, (2, 1, 28, 28), dtype=jnp.float32)

    # Train-mode forward (dropout active).
    out = classifier_forward(x, params, k_drop, training=True)
    out = jax.block_until_ready(out)
    assert out.shape == (2, 10)
    assert bool(jnp.all(jnp.isfinite(out)))
    # log_softmax rows should (approximately) exp-sum to 1.
    assert bool(jnp.allclose(jnp.sum(jnp.exp(out), axis=1), 1.0, atol=1e-4))

    # Eval-mode forward (dropout disabled): check against a pure-JAX reference.
    out_eval = classifier_forward(x, params, k_drop, training=False)
    out_eval = jax.block_until_ready(out_eval)
    assert out_eval.shape == (2, 10)
    assert bool(jnp.all(jnp.isfinite(out_eval)))
    assert bool(jnp.allclose(jnp.sum(jnp.exp(out_eval), axis=1), 1.0, atol=1e-4))
    ref = _reference_eval(x, params)
    assert bool(jnp.allclose(out_eval, ref, atol=3e-2, rtol=3e-2))

    print("KERNEL_OK")
</pallas_src>

<mosaic_0001>
module attributes {stable_mosaic.version = 11 : i64} {
  func.func @_mlp_kernel(%arg0: i32, %arg1: memref<32x784xf32, #tpu.memory_space<vmem>>, %arg2: memref<32x512xi8, #tpu.memory_space<vmem>>, %arg3: memref<784x256xbf16, #tpu.memory_space<vmem>>, %arg4: memref<1x256xf32, #tpu.memory_space<vmem>>, %arg5: memref<256x128xbf16, #tpu.memory_space<vmem>>, %arg6: memref<1x128xf32, #tpu.memory_space<vmem>>, %arg7: memref<128x128xbf16, #tpu.memory_space<vmem>>, %arg8: memref<1x128xf32, #tpu.memory_space<vmem>>, %arg9: memref<128x128xbf16, #tpu.memory_space<vmem>>, %arg10: memref<1x128xf32, #tpu.memory_space<vmem>>, %arg11: memref<32x128xf32, #tpu.memory_space<vmem>>) attributes {dimension_semantics = [#tpu.dimension_semantics<parallel>], iteration_bounds = array<i64: 1>, scalar_prefetch = 0 : i64, scratch_operands = 0 : i64, tpu.core_type = #tpu.core_type<tc>, window_params = [{transform_indices = @transform_0, window_bounds = array<i64: 32, 784>}, {transform_indices = @transform_1, window_bounds = array<i64: 32, 512>}, {pipeline_mode = #tpu.pipeline_mode<synchronous>, transform_indices = @transform_2, window_bounds = array<i64: 784, 256>}, {pipeline_mode = #tpu.pipeline_mode<synchronous>, transform_indices = @transform_3, window_bounds = array<i64: 1, 256>}, {pipeline_mode = #tpu.pipeline_mode<synchronous>, transform_indices = @transform_4, window_bounds = array<i64: 256, 128>}, {pipeline_mode = #tpu.pipeline_mode<synchronous>, transform_indices = @transform_5, window_bounds = array<i64: 1, 128>}, {pipeline_mode = #tpu.pipeline_mode<synchronous>, transform_indices = @transform_6, window_bounds = array<i64: 128, 128>}, {pipeline_mode = #tpu.pipeline_mode<synchronous>, transform_indices = @transform_7, window_bounds = array<i64: 1, 128>}, {pipeline_mode = #tpu.pipeline_mode<synchronous>, transform_indices = @transform_8, window_bounds = array<i64: 128, 128>}, {pipeline_mode = #tpu.pipeline_mode<synchronous>, transform_indices = @transform_9, window_bounds = array<i64: 1, 128>}, {transform_indices = @transform_10, window_bounds = array<i64: 32, 128>}]} {
    %c0 = arith.constant 0 : index
    %c0_0 = arith.constant 0 : index
    %0 = vector.load %arg1[%c0, %c0_0] : memref<32x784xf32, #tpu.memory_space<vmem>>, vector<32x784xf32>
    %1 = arith.truncf %0 : vector<32x784xf32> to vector<32x784xbf16>
    %c0_1 = arith.constant 0 : index
    %c0_2 = arith.constant 0 : index
    %2 = vector.load %arg3[%c0_1, %c0_2] : memref<784x256xbf16, #tpu.memory_space<vmem>>, vector<784x256xbf16>
    %cst = arith.constant dense<0.000000e+00> : vector<32x256xf32>
    %3 = tpu.matmul %1, %2, %cst {dimension_numbers = #tpu.dot_dimension_numbers<[1], [0], [0], [1], [0, 0, 1, 1], [], []>} : vector<32x784xbf16>, vector<784x256xbf16>, vector<32x256xf32> -> vector<32x256xf32>
    %c0_3 = arith.constant 0 : index
    %c0_4 = arith.constant 0 : index
    %4 = vector.load %arg4[%c0_3, %c0_4] : memref<1x256xf32, #tpu.memory_space<vmem>>, vector<1x256xf32>
    %5 = vector.broadcast %4 : vector<1x256xf32> to vector<32x256xf32>
    %6 = arith.addf %3, %5 : vector<32x256xf32>
    %cst_5 = arith.constant 0.000000e+00 : f32
    %7 = vector.broadcast %cst_5 : f32 to vector<32x256xf32>
    %8 = arith.maximumf %6, %7 : vector<32x256xf32>
    %c0_6 = arith.constant 0 : index
    %c0_7 = arith.constant 0 : index
    %9 = vector.load %arg2[%c0_6, %c0_7] : memref<32x512xi8, #tpu.memory_space<vmem>>, vector<32x256xi8>
    %10 = arith.sitofp %9 : vector<32x256xi8> to vector<32x256xf32>
    %cst_8 = arith.constant 1.250000e+00 : f32
    %11 = vector.broadcast %cst_8 : f32 to vector<32x256xf32>
    %12 = arith.mulf %10, %11 : vector<32x256xf32>
    %13 = arith.mulf %8, %12 : vector<32x256xf32>
    %14 = arith.truncf %13 : vector<32x256xf32> to vector<32x256xbf16>
    %c0_9 = arith.constant 0 : index
    %c0_10 = arith.constant 0 : index
    %15 = vector.load %arg5[%c0_9, %c0_10] : memref<256x128xbf16, #tpu.memory_space<vmem>>, vector<256x128xbf16>
    %cst_11 = arith.constant dense<0.000000e+00> : vector<32x128xf32>
    %16 = tpu.matmul %14, %15, %cst_11 {dimension_numbers = #tpu.dot_dimension_numbers<[1], [0], [0], [1], [0, 0, 1, 1], [], []>} : vector<32x256xbf16>, vector<256x128xbf16>, vector<32x128xf32> -> vector<32x128xf32>
    %c0_12 = arith.constant 0 : index
    %c0_13 = arith.constant 0 : index
    %17 = vector.load %arg6[%c0_12, %c0_13] : memref<1x128xf32, #tpu.memory_space<vmem>>, vector<1x128xf32>
    %18 = vector.broadcast %17 : vector<1x128xf32> to vector<32x128xf32>
    %19 = arith.addf %16, %18 : vector<32x128xf32>
    %cst_14 = arith.constant 0.000000e+00 : f32
    %20 = vector.broadcast %cst_14 : f32 to vector<32x128xf32>
    %21 = arith.maximumf %19, %20 : vector<32x128xf32>
    %c0_15 = arith.constant 0 : index
    %c256 = arith.constant 256 : index
    %22 = vector.load %arg2[%c0_15, %c256] : memref<32x512xi8, #tpu.memory_space<vmem>>, vector<32x128xi8>
    %23 = arith.sitofp %22 : vector<32x128xi8> to vector<32x128xf32>
    %cst_16 = arith.constant 1.250000e+00 : f32
    %24 = vector.broadcast %cst_16 : f32 to vector<32x128xf32>
    %25 = arith.mulf %23, %24 : vector<32x128xf32>
    %26 = arith.mulf %21, %25 : vector<32x128xf32>
    %27 = arith.truncf %26 : vector<32x128xf32> to vector<32x128xbf16>
    %c0_17 = arith.constant 0 : index
    %c0_18 = arith.constant 0 : index
    %28 = vector.load %arg7[%c0_17, %c0_18] : memref<128x128xbf16, #tpu.memory_space<vmem>>, vector<128x128xbf16>
    %cst_19 = arith.constant dense<0.000000e+00> : vector<32x128xf32>
    %29 = tpu.matmul %27, %28, %cst_19 {dimension_numbers = #tpu.dot_dimension_numbers<[1], [0], [0], [1], [0, 0, 1, 1], [], []>} : vector<32x128xbf16>, vector<128x128xbf16>, vector<32x128xf32> -> vector<32x128xf32>
    %c0_20 = arith.constant 0 : index
    %c0_21 = arith.constant 0 : index
    %30 = vector.load %arg8[%c0_20, %c0_21] : memref<1x128xf32, #tpu.memory_space<vmem>>, vector<1x128xf32>
    %31 = vector.broadcast %30 : vector<1x128xf32> to vector<32x128xf32>
    %32 = arith.addf %29, %31 : vector<32x128xf32>
    %cst_22 = arith.constant 0.000000e+00 : f32
    %33 = vector.broadcast %cst_22 : f32 to vector<32x128xf32>
    %34 = arith.maximumf %32, %33 : vector<32x128xf32>
    %c0_23 = arith.constant 0 : index
    %c384 = arith.constant 384 : index
    %35 = vector.load %arg2[%c0_23, %c384] : memref<32x512xi8, #tpu.memory_space<vmem>>, vector<32x128xi8>
    %36 = arith.sitofp %35 : vector<32x128xi8> to vector<32x128xf32>
    %cst_24 = arith.constant 1.250000e+00 : f32
    %37 = vector.broadcast %cst_24 : f32 to vector<32x128xf32>
    %38 = arith.mulf %36, %37 : vector<32x128xf32>
    %39 = arith.mulf %34, %38 : vector<32x128xf32>
    %40 = arith.truncf %39 : vector<32x128xf32> to vector<32x128xbf16>
    %c0_25 = arith.constant 0 : index
    %c0_26 = arith.constant 0 : index
    %41 = vector.load %arg9[%c0_25, %c0_26] : memref<128x128xbf16, #tpu.memory_space<vmem>>, vector<128x128xbf16>
    %cst_27 = arith.constant dense<0.000000e+00> : vector<32x128xf32>
    %42 = tpu.matmul %40, %41, %cst_27 {dimension_numbers = #tpu.dot_dimension_numbers<[1], [0], [0], [1], [0, 0, 1, 1], [], []>} : vector<32x128xbf16>, vector<128x128xbf16>, vector<32x128xf32> -> vector<32x128xf32>
    %c0_28 = arith.constant 0 : index
    %c0_29 = arith.constant 0 : index
    %43 = vector.load %arg10[%c0_28, %c0_29] : memref<1x128xf32, #tpu.memory_space<vmem>>, vector<1x128xf32>
    %44 = vector.broadcast %43 : vector<1x128xf32> to vector<32x128xf32>
    %45 = arith.addf %42, %44 : vector<32x128xf32>
    %cst_30 = arith.constant dense<0xFF800000> : vector<32xf32>
    %46 = vector.multi_reduction <maximumf>, %45, %cst_30 [1] : vector<32x128xf32> to vector<32xf32>
    %47 = vector.shape_cast %46 : vector<32xf32> to vector<32x1xf32>
    %48 = vector.broadcast %47 : vector<32x1xf32> to vector<32x128xf32>
    %49 = arith.subf %45, %48 : vector<32x128xf32>
    %50 = math.exp %49 : vector<32x128xf32>
    %cst_31 = arith.constant dense<0.000000e+00> : vector<32xf32>
    %51 = vector.multi_reduction <add>, %50, %cst_31 [1] : vector<32x128xf32> to vector<32xf32>
    %52 = vector.shape_cast %51 : vector<32xf32> to vector<32x1xf32>
    %53 = math.log %52 : vector<32x1xf32>
    %54 = vector.broadcast %53 : vector<32x1xf32> to vector<32x128xf32>
    %55 = arith.subf %49, %54 : vector<32x128xf32>
    %c0_32 = arith.constant 0 : index
    %c0_33 = arith.constant 0 : index
    %56 = vector.load %arg11[%c0_32, %c0_33] : memref<32x128xf32, #tpu.memory_space<vmem>>, vector<32x128xf32>
    tpu.vector_store %arg11[%c0_32, %c0_33], %55 {strides = array<i32>} : memref<32x128xf32, #tpu.memory_space<vmem>>, vector<32x128xf32>,
    return
  }
  func.func @transform_0(%arg0: i32) -> (i32, i32) {
    %c0_i32 = arith.constant 0 : i32
    %c0_i32_0 = arith.constant 0 : i32
    return %arg0, %c0_i32 : i32, i32
  }
  func.func @transform_1(%arg0: i32) -> (i32, i32) {
    %c0_i32 = arith.constant 0 : i32
    %c0_i32_0 = arith.constant 0 : i32
    return %arg0, %c0_i32 : i32, i32
  }
  func.func @transform_2(%arg0: i32) -> (i32, i32) {
    %c0_i32 = arith.constant 0 : i32
    %c0_i32_0 = arith.constant 0 : i32
    %c0_i32_1 = arith.constant 0 : i32
    return %c0_i32, %c0_i32_0 : i32, i32
  }
  func.func @transform_3(%arg0: i32) -> (i32, i32) {
    %c0_i32 = arith.constant 0 : i32
    %c0_i32_0 = arith.constant 0 : i32
    %c0_i32_1 = arith.constant 0 : i32
    return %c0_i32, %c0_i32_0 : i32, i32
  }
  func.func @transform_4(%arg0: i32) -> (i32, i32) {
    %c0_i32 = arith.constant 0 : i32
    %c0_i32_0 = arith.constant 0 : i32
    %c0_i32_1 = arith.constant 0 : i32
    return %c0_i32, %c0_i32_0 : i32, i32
  }
  func.func @transform_5(%arg0: i32) -> (i32, i32) {
    %c0_i32 = arith.constant 0 : i32
    %c0_i32_0 = arith.constant 0 : i32
    %c0_i32_1 = arith.constant 0 : i32
    return %c0_i32, %c0_i32_0 : i32, i32
  }
  func.func @transform_6(%arg0: i32) -> (i32, i32) {
    %c0_i32 = arith.constant 0 : i32
    %c0_i32_0 = arith.constant 0 : i32
    %c0_i32_1 = arith.constant 0 : i32
    return %c0_i32, %c0_i32_0 : i32, i32
  }
  func.func @transform_7(%arg0: i32) -> (i32, i32) {
    %c0_i32 = arith.constant 0 : i32
    %c0_i32_0 = arith.constant 0 : i32
    %c0_i32_1 = arith.constant 0 : i32
    return %c0_i32, %c0_i32_0 : i32, i32
  }
  func.func @transform_8(%arg0: i32) -> (i32, i32) {
    %c0_i32 = arith.constant 0 : i32
    %c0_i32_0 = arith.constant 0 : i32
    %c0_i32_1 = arith.constant 0 : i32
    return %c0_i32, %c0_i32_0 : i32, i32
  }
  func.func @transform_9(%arg0: i32) -> (i32, i32) {
    %c0_i32 = arith.constant 0 : i32
    %c0_i32_0 = arith.constant 0 : i32
    %c0_i32_1 = arith.constant 0 : i32
    return %c0_i32, %c0_i32_0 : i32, i32
  }
  func.func @transform_10(%arg0: i32) -> (i32, i32) {
    %c0_i32 = arith.constant 0 : i32
    %c0_i32_0 = arith.constant 0 : i32
    return %arg0, %c0_i32 : i32, i32
  }
}

</mosaic_0001>

<bundles_post_ra>
// kernel: tpu_custom_call.1
= control target key start
LH: loop header
LB: loop body
LE: loop exit
PB: predicated region body
PF: predicated region fallthrough
CT: control target
= control target key end

     0   :  { %15 = vsyncpa [#allocation3], 0  ;;  %s2603_s0 = inlined_call_operand.hbm [shape: f32[32,784], index: 0, kind: input, shape index: {}]   ;;  %s2604_s1 = inlined_call_operand.hbm [shape: s8[32,512], index: 1, kind: input, shape index: {}]   ;;  %s2605_s2 = inlined_call_operand.hbm [shape: bf16[784,256], index: 2, kind: input, shape index: {}]   ;;  %s2606_s3 = inlined_call_operand.vmem [shape: f32[1,256], index: 3, kind: input, shape index: {}]   ;;  %s2607_s4 = inlined_call_operand.hbm [shape: bf16[256,128], index: 4, kind: input, shape index: {}]   ;;  %s2608_s5 = inlined_call_operand.vmem [shape: f32[1,128], index: 5, kind: input, shape index: {}]   ;;  %s2609_s6 = inlined_call_operand.hbm [shape: bf16[128,128], index: 6, kind: input, shape index: {}]   ;;  %s2610_s7 = inlined_call_operand.vmem [shape: f32[1,128], index: 7, kind: input, shape index: {}]   ;;  %s2611_s8 = inlined_call_operand.hbm [shape: bf16[128,128], index: 8, kind: input, shape index: {}]   ;;  %s2612_s9 = inlined_call_operand.vmem [shape: f32[1,128], index: 9, kind: input, shape index: {}]   ;;  %s2613_s10 = inlined_call_operand.hbm [shape: f32[32,128], index: 10, kind: output, shape index: {}]  }
   0x1   :  { %16 = vsyncpa [#allocation6], 0 }
   0x2   :  { %17 = vsyncpa [#allocation9], 0 }
   0x3   :  { %18 = vsyncpa [#allocation12], 0  ;;  %s38_s15 = sshll.u32 %s2604_s1, 4  ;;  %s39_s15 = int_to_ptr.hbm [resolvable:$true] %s38_s15 }
   0x4   :  { %19 = vsyncpa [#allocation4], 0  ;;  %s2420_s16 = smov [#allocation5]   ;;  %s63_s20 = sshll.u32 %s2607_s4, 4  ;;  %s64_s20 = int_to_ptr.hbm [resolvable:$true] %s63_s20 }
   0x5   :  { %s40_s17 = sshll.u32 %s2420_s16, 4  ;;  %s2421_s21 = smov [#allocation8]   ;;  %s41_s17 = int_to_ptr.vmem [resolvable:$true] %s40_s17 }
   0x6   :  { %43 = dma.hbm_to_vmem [thread:$0]  %s39_s15, 512, %s41_s17, [#allocation6]  }
   0x7   :  { %s65_s22 = sshll.u32 %s2421_s21, 4  ;;  %s2422_s23 = smov 64   ;;  %s66_s22 = int_to_ptr.vmem [resolvable:$true] %s65_s22 }
   0x8   :  { %s2423_s24 = smov 4   ;;  %s24_s26 = sshll.u32 %s2603_s0, 4  ;;  %s25_s26 = int_to_ptr.hbm [resolvable:$true] %s24_s26 }
   0x9   :  { %71 = dma.hbm_to_vmem [thread:$0]  %s64_s20, 2048, %s66_s22, [#allocation9], %s2422_s23, %s2422_s23, %s2423_s24  }
   0xa   :  { %s2424_s27 = smov [#allocation2]   ;;  %s48_s30 = sshll.u32 %s2605_s2, 4  ;;  %s49_s30 = int_to_ptr.hbm [resolvable:$true] %s48_s30 }
   0xb   :  { %s26_s28 = sshll.u32 %s2424_s27, 4  ;;  %s2425_s11 = smov 896   ;;  %s27_s28 = int_to_ptr.vmem [resolvable:$true] %s26_s28 }
   0xc   :  { %s2426_s12 = smov 56   ;;  %s2427_s13 = smov [#allocation7]  }
   0xd   :  { %32 = dma.hbm_to_vmem [thread:$0]  %s25_s26, 3584, %s27_s28, [#allocation3], %s2425_s11, %s2425_s11, %s2426_s12  }
   0xe   :  { %s50_s14 = sshll.u32 %s2427_s13, 4  ;;  %s2428_s15 = smov 128   ;;  %s51_s14 = int_to_ptr.vmem [resolvable:$true] %s50_s14 }
   0xf   :  { %s2429_s16 = smov 8   ;;  %s78_s18 = sshll.u32 %s2609_s6, 4  ;;  %s79_s18 = int_to_ptr.hbm [resolvable:$true] %s78_s18 }
  0x10   :  { %56 = dma.hbm_to_vmem [thread:$0]  %s49_s30, 12544, %s51_s14, [#allocation6], %s2428_s15, %s2428_s15, %s2429_s16  }
  0x11   :  { %s2430_s19 = smov [#allocation10]   ;;  %s93_s22 = sshll.u32 %s2611_s8, 4  ;;  %s94_s22 = int_to_ptr.hbm [resolvable:$true] %s93_s22 }
  0x12   :  { %s80_s2 = sshll.u32 %s2430_s19, 4  ;;  %s2431_s1 = smov [#allocation11]   ;;  %s81_s2 = int_to_ptr.vmem [resolvable:$true] %s80_s2 }
  0x13   :  { %86 = dma.hbm_to_vmem [thread:$0]  %s79_s18, 1024, %s81_s2, [#allocation9], %s2422_s23, %s2422_s23, %s2423_s24  }
  0x14   :  { %s95_s25 = sshll.u32 %s2431_s1, 4  ;;  %s96_s25 = int_to_ptr.vmem [resolvable:$true] %s95_s25 }
  0x15   :  { %101 = dma.hbm_to_vmem [thread:$0]  %s94_s22, 1024, %s96_s25, [#allocation12], %s2422_s23, %s2422_s23, %s2423_s24  }
  0x16   :  { %2410 = dma.done.wait [#allocation3], 3584  }
  0x17   :  { %2411 = vsyncadd [#allocation3], 4294963712 }
  0x18   :  { %2412 = dma.done.wait [#allocation6], 13056  }
  0x19   :  { %2413 = vsyncadd [#allocation6], 4294954240 }
  0x1a   :  { %2414 = dma.done.wait [#allocation9], 3072  }
  0x1b   :  { %2415 = vsyncadd [#allocation9], 4294964224 }
  0x1c   :  { %2416 = dma.done.wait [#allocation12], 1024  }
  0x1d   :  { %2417 = vsyncadd [#allocation12], 4294966272  ;;  %v1598_v0 = vld [vmem:[#allocation7 + $0x70] sm:$0xf]  ;;  %v2079_v1 = vld [vmem:[#allocation7 + $0x74] sm:$0xf0] }
  0x1e   :  { %v1662_v2 = vld [vmem:[#allocation7 + $0xf0] sm:$0xf]  ;;  %v1599_v3 = vor.u32 %v2079_v1, %v1598_v0  ;;  %v2095_v4 = vld [vmem:[#allocation7 + $0xf4] sm:$0xf0]  ;;  %v1590_v11 = vld [vmem:[#allocation7 + $0x60] sm:$0xf] }
  0x1f   :  { %v1726_v5 = vld [vmem:[#allocation7 + $0x170] sm:$0xf]  ;;  %v2111_v6 = vld [vmem:[#allocation7 + $0x174] sm:$0xf0]  ;;  %v1663_v7 = vor.u32 %v2095_v4, %v1662_v2  ;;  %v2077_v13 = vld [vmem:[#allocation7 + $0x64] sm:$0xf0] }
  0x20   :  { %v1727_v8 = vor.u32 %v2111_v6, %v1726_v5  ;;  %v1790_v9 = vld [vmem:[#allocation7 + $0x1f0] sm:$0xf]  ;;  %v2127_v10 = vld [vmem:[#allocation7 + $0x1f4] sm:$0xf0]  ;;  %772 = vmatpush.bf16.msra.mxu0 %v1599_v3  ;;  %v1654_v14 = vld [vmem:[#allocation7 + $0xe0] sm:$0xf]  ;;  %v1591_v16 = vor.u32 %v2077_v13, %v1590_v11 }
  0x21   :  { %v1791_v12 = vor.u32 %v2127_v10, %v1790_v9  ;;  %v2093_v15 = vld [vmem:[#allocation7 + $0xe4] sm:$0xf0]  ;;  %791 = vmatpush.bf16.msra.mxu1 %v1663_v7  ;;  %v1718_v18 = vld [vmem:[#allocation7 + $0x160] sm:$0xf]  ;;  %v1582_v23 = vld [vmem:[#allocation7 + $0x50] sm:$0xf] }
  0x22   :  { %810 = vmatpush.bf16.msra.mxu2 %v1727_v8  ;;  %v1655_v17 = vor.u32 %v2093_v15, %v1654_v14  ;;  %v2109_v19 = vld [vmem:[#allocation7 + $0x164] sm:$0xf0]  ;;  %v1782_v20 = vld [vmem:[#allocation7 + $0x1e0] sm:$0xf]  ;;  %v2075_v24 = vld [vmem:[#allocation7 + $0x54] sm:$0xf0] }
  0x23   :  { %829 = vmatpush.bf16.msra.mxu3 %v1791_v12  ;;  %v1719_v21 = vor.u32 %v2109_v19, %v1718_v18  ;;  %v2125_v22 = vld [vmem:[#allocation7 + $0x1e4] sm:$0xf0]  ;;  %v1646_v26 = vld [vmem:[#allocation7 + $0xd0] sm:$0xf]  ;;  %v2091_v27 = vld [vmem:[#allocation7 + $0xd4] sm:$0xf0]  ;;  %v1583_v29 = vor.u32 %v2075_v24, %v1582_v23 }
  0x24   :  { %v1783_v25 = vor.u32 %v2125_v22, %v1782_v20  ;;  %v1710_v28 = vld [vmem:[#allocation7 + $0x150] sm:$0xf]  ;;  %773 = vmatpush.bf16.msra.mxu0 %v1591_v16  ;;  %v2107_v30 = vld [vmem:[#allocation7 + $0x154] sm:$0xf0]  ;;  %v1647_v33 = vor.u32 %v2091_v27, %v1646_v26  ;;  %v1574_v35 = vld [vmem:[#allocation7 + $0x40] sm:$0xf] }
  0x25   :  { %v1774_v31 = vld [vmem:[#allocation7 + $0x1d0] sm:$0xf]  ;;  %v2123_v32 = vld [vmem:[#allocation7 + $0x1d4] sm:$0xf0]  ;;  %792 = vmatpush.bf16.msra.mxu1 %v1655_v17  ;;  %v1711_v34 = vor.u32 %v2107_v30, %v1710_v28  ;;  %v2073_v36 = vld [vmem:[#allocation7 + $0x44] sm:$0xf0] }
  0x26   :  { %811 = vmatpush.bf16.msra.mxu2 %v1719_v21  ;;  %v1638_v37 = vld [vmem:[#allocation7 + $0xc0] sm:$0xf]  ;;  %v1775_v38 = vor.u32 %v2123_v32, %v1774_v31  ;;  %v2089_v39 = vld [vmem:[#allocation7 + $0xc4] sm:$0xf0]  ;;  %v1575_v44 = vor.u32 %v2073_v36, %v1574_v35  ;;  %v1566_v47 = vld [vmem:[#allocation7 + $0x30] sm:$0xf] }
  0x27   :  { %830 = vmatpush.bf16.msra.mxu3 %v1783_v25  ;;  %v1702_v40 = vld [vmem:[#allocation7 + $0x140] sm:$0xf]  ;;  %v2105_v41 = vld [vmem:[#allocation7 + $0x144] sm:$0xf0]  ;;  %v1639_v45 = vor.u32 %v2089_v39, %v1638_v37  ;;  %v2071_v48 = vld [vmem:[#allocation7 + $0x34] sm:$0xf0] }
  0x28   :  { %v1766_v42 = vld [vmem:[#allocation7 + $0x1c0] sm:$0xf]  ;;  %v2121_v43 = vld [vmem:[#allocation7 + $0x1c4] sm:$0xf0]  ;;  %774 = vmatpush.bf16.msra.mxu0 %v1583_v29  ;;  %v1703_v46 = vor.u32 %v2105_v41, %v1702_v40  ;;  %v1630_v49 = vld [vmem:[#allocation7 + $0xb0] sm:$0xf]  ;;  %v1567_v56 = vor.u32 %v2071_v48, %v1566_v47 }
  0x29   :  { %793 = vmatpush.bf16.msra.mxu1 %v1647_v33  ;;  %v1767_v50 = vor.u32 %v2121_v43, %v1766_v42  ;;  %v2087_v51 = vld [vmem:[#allocation7 + $0xb4] sm:$0xf0]  ;;  %v1694_v52 = vld [vmem:[#allocation7 + $0x130] sm:$0xf]  ;;  %v1558_v59 = vld [vmem:[#allocation7 + $0x20] sm:$0xf] }
  0x2a   :  { %812 = vmatpush.bf16.msra.mxu2 %v1711_v34  ;;  %v2103_v53 = vld [vmem:[#allocation7 + $0x134] sm:$0xf0]  ;;  %v1758_v54 = vld [vmem:[#allocation7 + $0x1b0] sm:$0xf]  ;;  %v1631_v57 = vor.u32 %v2087_v51, %v1630_v49  ;;  %v2069_v60 = vld [vmem:[#allocation7 + $0x24] sm:$0xf0] }
  0x2b   :  { %831 = vmatpush.bf16.msra.mxu3 %v1775_v38  ;;  %v2119_v55 = vld [vmem:[#allocation7 + $0x1b4] sm:$0xf0]  ;;  %v1695_v58 = vor.u32 %v2103_v53, %v1694_v52  ;;  %v1622_v61 = vld [vmem:[#allocation7 + $0xa0] sm:$0xf]  ;;  %v2085_v63 = vld [vmem:[#allocation7 + $0xa4] sm:$0xf0]  ;;  %v1559_v4 = vor.u32 %v2069_v60, %v1558_v59 }
  0x2c   :  { %775 = vmatpush.bf16.msra.mxu0 %v1575_v44  ;;  %v1759_v62 = vor.u32 %v2119_v55, %v1758_v54  ;;  %v1686_v0 = vld [vmem:[#allocation7 + $0x120] sm:$0xf]  ;;  %v2101_v1 = vld [vmem:[#allocation7 + $0x124] sm:$0xf0]  ;;  %v1623_v5 = vor.u32 %v2085_v63, %v1622_v61  ;;  %v1550_v7 = vld [vmem:[#allocation7 + $0x10] sm:$0xf] }
  0x2d   :  { %794 = vmatpush.bf16.msra.mxu1 %v1639_v45  ;;  %v1750_v2 = vld [vmem:[#allocation7 + $0x1a0] sm:$0xf]  ;;  %v2117_v3 = vld [vmem:[#allocation7 + $0x1a4] sm:$0xf0]  ;;  %v1687_v6 = vor.u32 %v2101_v1, %v1686_v0  ;;  %v2067_v8 = vld [vmem:[#allocation7 + $0x14] sm:$0xf0] }
  0x2e   :  { %813 = vmatpush.bf16.msra.mxu2 %v1703_v46  ;;  %v1614_v9 = vld [vmem:[#allocation7 + $0x90] sm:$0xf]  ;;  %v1751_v10 = vor.u32 %v2117_v3, %v1750_v2  ;;  %v2083_v11 = vld [vmem:[#allocation7 + $0x94] sm:$0xf0]  ;;  %v1551_v16 = vor.u32 %v2067_v8, %v1550_v7  ;;  %v1542_v17 = vld [vmem:[#allocation7] sm:$0xf] }
  0x2f   :  { %832 = vmatpush.bf16.msra.mxu3 %v1767_v50  ;;  %v1678_v12 = vld [vmem:[#allocation7 + $0x110] sm:$0xf]  ;;  %v2099_v13 = vld [vmem:[#allocation7 + $0x114] sm:$0xf0]  ;;  %v2065_v18 = vld [vmem:[#allocation7 + $0x4] sm:$0xf0]  ;;  %v1615_v20 = vor.u32 %v2083_v11, %v1614_v9 }
  0x30   :  { %776 = vmatpush.bf16.msra.mxu0 %v1567_v56  ;;  %v1742_v14 = vld [vmem:[#allocation7 + $0x190] sm:$0xf]  ;;  %v2115_v15 = vld [vmem:[#allocation7 + $0x194] sm:$0xf0]  ;;  %v1606_v19 = vld [vmem:[#allocation7 + $0x80] sm:$0xf]  ;;  %v1679_v21 = vor.u32 %v2099_v13, %v1678_v12  ;;  %v1543_v32 = vor.u32 %v2065_v18, %v1542_v17 }
  0x31   :  { %795 = vmatpush.bf16.msra.mxu1 %v1631_v57  ;;  %v2081_v22 = vld [vmem:[#allocation7 + $0x84] sm:$0xf0]  ;;  %v1670_v23 = vld [vmem:[#allocation7 + $0x100] sm:$0xf]  ;;  %v1743_v25 = vor.u32 %v2115_v15, %v1742_v14  ;;  %v136_v29 = vld [vmem:[#allocation2 + $0x38] sm:$0xff]  ;;  %vm765_vm0 = vcmask 130048  }
  0x32   :  { %814 = vmatpush.bf16.msra.mxu2 %v1695_v58  ;;  %v2097_v24 = vld [vmem:[#allocation7 + $0x104] sm:$0xf0]  ;;  %v1734_v26 = vld [vmem:[#allocation7 + $0x180] sm:$0xf]  ;;  %v1854_v30 = vld [vmem:[#allocation7 + $0x270] sm:$0xf]  ;;  %v1607_v36 = vor.u32 %v2081_v22, %v1606_v19 }
  0x33   :  { %833 = vmatpush.bf16.msra.mxu3 %v1759_v62  ;;  %v2113_v27 = vld [vmem:[#allocation7 + $0x184] sm:$0xf0]  ;;  %v129_v28 = vld [vmem:[#allocation2] sm:$0xff]  ;;  %v2143_v31 = vld [vmem:[#allocation7 + $0x274] sm:$0xf0]  ;;  %v1671_v37 = vor.u32 %v2097_v24, %v1670_v23  ;;  %s1524_s29 = sshll.u32 %s2613_s10, 4  ;;  %s1525_s29 = int_to_ptr.hbm [resolvable:$true] %s1524_s29 }
  0x34   :  { %777 = vmatpush.bf16.msra.mxu0 %v1559_v4  ;;  %v130_v33 = vld [vmem:[#allocation2 + $0x8] sm:$0xff]  ;;  %v1918_v34 = vld [vmem:[#allocation7 + $0x2f0] sm:$0xf]  ;;  %v2159_v35 = vld [vmem:[#allocation7 + $0x2f4] sm:$0xf0]  ;;  %v1735_v41 = vor.u32 %v2113_v27, %v1734_v26  ;;  %v1855_v42 = vor.u32 %v2143_v31, %v1854_v30  ;;  %v2518_v46 = vpack.c.bf16 %v136_v29, %v129_v28 }
  0x35   :  { %796 = vmatpush.bf16.msra.mxu1 %v1623_v5  ;;  %v137_v38 = vld [vmem:[#allocation2 + $0x40] sm:$0xff]  ;;  %v131_v39 = vld [vmem:[#allocation2 + $0x10] sm:$0xff]  ;;  %v138_v40 = vld [vmem:[#allocation2 + $0x48] sm:$0xff]  ;;  %v1919_v47 = vor.u32 %v2159_v35, %v1918_v34 }
  0x36   :  { %815 = vmatpush.bf16.msra.mxu2 %v1687_v6  ;;  %v132_v43 = vld [vmem:[#allocation2 + $0x18] sm:$0xff]  ;;  %v139_v44 = vld [vmem:[#allocation2 + $0x50] sm:$0xff]  ;;  %v1846_v49 = vld [vmem:[#allocation7 + $0x260] sm:$0xf]  ;;  %v2520_v51 = vpack.c.bf16 %v137_v38, %v130_v33  ;;  %v2522_v52 = vpack.c.bf16 %v138_v40, %v131_v39 }
  0x37   :  { %834 = vmatpush.bf16.msra.mxu3 %v1751_v10  ;;  %v2078_v45 = vld [vmem:[#allocation7 + $0x74] sm:$0xf]  ;;  %v1600_v48 = vld [vmem:[#allocation7 + $0x78] sm:$0xf0]  ;;  %v2141_v50 = vld [vmem:[#allocation7 + $0x264] sm:$0xf0]  ;;  %v2524_v55 = vpack.c.bf16 %v139_v44, %v132_v43 }
  0x38   :  { %778 = vmatpush.bf16.msra.mxu0 %v1551_v16  ;;  %v1910_v53 = vld [vmem:[#allocation7 + $0x2e0] sm:$0xf]  ;;  %v2157_v54 = vld [vmem:[#allocation7 + $0x2e4] sm:$0xf0]  ;;  %v1603_v56 = vor.u32 %v2078_v45, %v1600_v48  ;;  %v1847_v57 = vor.u32 %v2141_v50, %v1846_v49  ;;  %v2076_v58 = vld [vmem:[#allocation7 + $0x64] sm:$0xf] }
  0x39   :  { %797 = vmatpush.bf16.msra.mxu1 %v1615_v20  ;;  %v1911_v59 = vor.u32 %v2157_v54, %v1910_v53  ;;  %v1592_v60 = vld [vmem:[#allocation7 + $0x68] sm:$0xf0]  ;;  %v1838_v61 = vld [vmem:[#allocation7 + $0x250] sm:$0xf]  ;;  %v2139_v62 = vld [vmem:[#allocation7 + $0x254] sm:$0xf0] }
  0x3a   :  { %816 = vmatpush.bf16.msra.mxu2 %v1679_v21  ;;  %v1902_v63 = vld [vmem:[#allocation7 + $0x2d0] sm:$0xf]  ;;  %v2155_v0 = vld [vmem:[#allocation7 + $0x2d4] sm:$0xf0]  ;;  %v1595_v1 = vor.u32 %v2076_v58, %v1592_v60  ;;  %v1839_v2 = vor.u32 %v2139_v62, %v1838_v61  ;;  %v2074_v3 = vld [vmem:[#allocation7 + $0x54] sm:$0xf] }
  0x3b   :  { %835 = vmatpush.bf16.msra.mxu3 %v1743_v25  ;;  %v1584_v4 = vld [vmem:[#allocation7 + $0x58] sm:$0xf0]  ;;  %v1830_v5 = vld [vmem:[#allocation7 + $0x240] sm:$0xf]  ;;  %v1903_v6 = vor.u32 %v2155_v0, %v1902_v63  ;;  %v2137_v7 = vld [vmem:[#allocation7 + $0x244] sm:$0xf0] }
  0x3c   :  { %779 = vmatpush.bf16.msra.mxu0 %v1543_v32  ;;  %v1926_v8 = vld [vmem:[#allocation7 + $0x300] sm:$0xf]  ;;  %v2161_v9 = vld [vmem:[#allocation7 + $0x304] sm:$0xf0]  ;;  %v2072_v13 = vld [vmem:[#allocation7 + $0x44] sm:$0xf]  ;;  %v1587_v14 = vor.u32 %v2074_v3, %v1584_v4  ;;  %v1831_v15 = vor.u32 %v2137_v7, %v1830_v5 }
  0x3d   :  { %798 = vmatpush.bf16.msra.mxu1 %v1607_v36  ;;  %v1894_v10 = vld [vmem:[#allocation7 + $0x2c0] sm:$0xf]  ;;  %v2153_v11 = vld [vmem:[#allocation7 + $0x2c4] sm:$0xf0]  ;;  %v1927_v12 = vor.u32 %v2161_v9, %v1926_v8  ;;  %v1576_v16 = vld [vmem:[#allocation7 + $0x48] sm:$0xf0] }
  0x3e   :  { %817 = vmatpush.bf16.msra.mxu2 %v1671_v37  ;;  %v143_v17 = vld [vmem:[#allocation2 + $0x70] sm:$0xff]  ;;  %v150_v18 = vld [vmem:[#allocation2 + $0xa8] sm:$0xff]  ;;  %v1895_v19 = vor.u32 %v2153_v11, %v1894_v10  ;;  %v144_v20 = vld [vmem:[#allocation2 + $0x78] sm:$0xff]  ;;  %v1579_v29 = vor.u32 %v2072_v13, %v1576_v16 }
  0x3f   :  { %836 = vmatpush.bf16.msra.mxu3 %v1735_v41  ;;  %780 = vmatmul.bf16.vlgmr.msra.gmra.mxu0 %v2518_v46  ;;  %v1822_v21 = vld [vmem:[#allocation7 + $0x230] sm:$0xf]  ;;  %v2135_v22 = vld [vmem:[#allocation7 + $0x234] sm:$0xf0]  ;;  %v145_v26 = vld [vmem:[#allocation2 + $0x80] sm:$0xff]  ;;  %v2530_v34 = vpack.c.bf16 %v150_v18, %v143_v17 }
  0x40   :  { %848 = vmatpush.bf16.msrb.mxu0 %v1855_v42  ;;  %799 = vmatmul.bf16.vlgmr.msra.gmra.mxu1 %v2520_v51  ;;  %v151_v23 = vld [vmem:[#allocation2 + $0xb0] sm:$0xff]  ;;  %v2151_v25 = vld [vmem:[#allocation7 + $0x2b4] sm:$0xf0]  ;;  %v146_v28 = vld [vmem:[#allocation2 + $0x88] sm:$0xff]  ;;  %v1823_v30 = vor.u32 %v2135_v22, %v1822_v21 }
  0x41   :  { %867 = vmatpush.bf16.msrb.mxu1 %v1919_v47  ;;  %818 = vmatmul.bf16.vlgmr.msra.gmra.mxu2 %v2522_v52  ;;  %v1886_v24 = vld [vmem:[#allocation7 + $0x2b0] sm:$0xf]  ;;  %v152_v27 = vld [vmem:[#allocation2 + $0xb8] sm:$0xff]  ;;  %v153_v31 = vld [vmem:[#allocation2 + $0xc0] sm:$0xff]  ;;  %v2532_v39 = vpack.c.bf16 %v151_v23, %v144_v20 }
  0x42   :  { %837 = vmatmul.bf16.vlgmr.msra.gmra.mxu3 %v2524_v55  ;;  %893 = vmatpush.bf16.msrb.mxu2 %v1927_v12  ;;  %v2070_v32 = vld [vmem:[#allocation7 + $0x34] sm:$0xf]  ;;  %v1568_v33 = vld [vmem:[#allocation7 + $0x38] sm:$0xf0]  ;;  %v1887_v35 = vor.u32 %v2151_v25, %v1886_v24  ;;  %v1814_v36 = vld [vmem:[#allocation7 + $0x220] sm:$0xf]  ;;  %v2534_v40 = vpack.c.bf16 %v152_v27, %v145_v26  ;;  %v2536_v44 = vpack.c.bf16 %v153_v31, %v146_v28 }
  0x43   :  { %905 = vmatpush.bf16.msrb.mxu3 %v1603_v56  ;;  %v2133_v37 = vld [vmem:[#allocation7 + $0x224] sm:$0xf0]  ;;  %v2126_v38 = vld [vmem:[#allocation7 + $0x1f4] sm:$0xf]  ;;  %v1878_v41 = vld [vmem:[#allocation7 + $0x2a0] sm:$0xf]  ;;  %v1571_v47 = vor.u32 %v2070_v32, %v1568_v33 }
  0x44   :  { %849 = vmatpush.bf16.msrb.mxu0 %v1847_v57  ;;  %v2149_v42 = vld [vmem:[#allocation7 + $0x2a4] sm:$0xf0]  ;;  %v1792_v43 = vld [vmem:[#allocation7 + $0x1f8] sm:$0xf0]  ;;  %v1815_v48 = vor.u32 %v2133_v37, %v1814_v36  ;;  %v2068_v49 = vld [vmem:[#allocation7 + $0x24] sm:$0xf] }
  0x45   :  { %868 = vmatpush.bf16.msrb.mxu1 %v1911_v59  ;;  %v1795_v45 = vor.u32 %v2126_v38, %v1792_v43  ;;  %v2124_v50 = vld [vmem:[#allocation7 + $0x1e4] sm:$0xf]  ;;  %v1784_v53 = vld [vmem:[#allocation7 + $0x1e8] sm:$0xf0]  ;;  %v1879_v54 = vor.u32 %v2149_v42, %v1878_v41  ;;  %v1806_v57 = vld [vmem:[#allocation7 + $0x210] sm:$0xf] }
  0x46   :  { %v1560_v56 = vld [vmem:[#allocation7 + $0x28] sm:$0xf0]  ;;  %v2131_v58 = vld [vmem:[#allocation7 + $0x214] sm:$0xf0]  ;;  %v1870_v59 = vld [vmem:[#allocation7 + $0x290] sm:$0xf]  ;;  %v1787_v62 = vor.u32 %v2124_v50, %v1784_v53 }
  0x47   :  { %906 = vmatpush.bf16.msrb.mxu3 %v1595_v1  ;;  %v2147_v60 = vld [vmem:[#allocation7 + $0x294] sm:$0xf0]  ;;  %v2066_v61 = vld [vmem:[#allocation7 + $0x14] sm:$0xf]  ;;  %962 = vmatpush.bf16.msra.mxu2 %v1795_v45  ;;  %v1563_v63 = vor.u32 %v2068_v49, %v1560_v56  ;;  %v1807_v0 = vor.u32 %v2131_v58, %v1806_v57  ;;  %v1552_v1 = vld [vmem:[#allocation7 + $0x18] sm:$0xf0] }
  0x48   :  { %850 = vmatpush.bf16.msrb.mxu0 %v1839_v2  ;;  %v2122_v2 = vld [vmem:[#allocation7 + $0x1d4] sm:$0xf]  ;;  %v1776_v3 = vld [vmem:[#allocation7 + $0x1d8] sm:$0xf0]  ;;  %v1871_v4 = vor.u32 %v2147_v60, %v1870_v59  ;;  %v1798_v5 = vld [vmem:[#allocation7 + $0x200] sm:$0xf] }
  0x49   :  { %869 = vmatpush.bf16.msrb.mxu1 %v1903_v6  ;;  %v2129_v6 = vld [vmem:[#allocation7 + $0x204] sm:$0xf0]  ;;  %v1862_v7 = vld [vmem:[#allocation7 + $0x280] sm:$0xf]  ;;  %v2094_v9 = vld [vmem:[#allocation7 + $0xf4] sm:$0xf]  ;;  %v1779_v13 = vor.u32 %v2122_v2, %v1776_v3 }
  0x4a   :  { %v2145_v8 = vld [vmem:[#allocation7 + $0x284] sm:$0xf0]  ;;  %v1664_v10 = vld [vmem:[#allocation7 + $0xf8] sm:$0xf0]  ;;  %v2110_v11 = vld [vmem:[#allocation7 + $0x174] sm:$0xf] }
  0x4b   :  { %907 = vmatpush.bf16.msrb.mxu3 %v1587_v14  ;;  %v1728_v12 = vld [vmem:[#allocation7 + $0x178] sm:$0xf0]  ;;  %963 = vmatpush.bf16.msra.mxu2 %v1787_v62  ;;  %v1555_v14 = vor.u32 %v2066_v61, %v1552_v1  ;;  %v2064_v16 = vld [vmem:[#allocation7 + $0x4] sm:$0xf]  ;;  %v1768_v18 = vld [vmem:[#allocation7 + $0x1c8] sm:$0xf0]  ;;  %v1667_v23 = vor.u32 %v2094_v9, %v1664_v10 }
  0x4c   :  { %851 = vmatpush.bf16.msrb.mxu0 %v1831_v15  ;;  %v1799_v15 = vor.u32 %v2129_v6, %v1798_v5  ;;  %v2120_v17 = vld [vmem:[#allocation7 + $0x1c4] sm:$0xf]  ;;  %v1544_v20 = vld [vmem:[#allocation7 + $0x8] sm:$0xf0]  ;;  %v140_v22 = vld [vmem:[#allocation2 + $0x58] sm:$0xff]  ;;  %v1731_v25 = vor.u32 %v2110_v11, %v1728_v12 }
  0x4d   :  { %870 = vmatpush.bf16.msrb.mxu1 %v1895_v19  ;;  %v1863_v19 = vor.u32 %v2145_v8, %v1862_v7  ;;  %v133_v21 = vld [vmem:[#allocation2 + $0x20] sm:$0xff]  ;;  %v134_v24 = vld [vmem:[#allocation2 + $0x28] sm:$0xff]  ;;  %v2142_v26 = vld [vmem:[#allocation7 + $0x274] sm:$0xf]  ;;  %v1771_v31 = vor.u32 %v2120_v17, %v1768_v18  ;;  %v1547_v32 = vor.u32 %v2064_v16, %v1544_v20 }
  0x4e   :  { %v1856_v27 = vld [vmem:[#allocation7 + $0x278] sm:$0xf0]  ;;  %v141_v28 = vld [vmem:[#allocation2 + $0x60] sm:$0xff]  ;;  %v2542_v37 = vpack.c.bf16 %v140_v22, %v133_v21  ;;  %v1720_v41 = vld [vmem:[#allocation7 + $0x168] sm:$0xf0] }
  0x4f   :  { %908 = vmatpush.bf16.msrb.mxu3 %v1579_v29  ;;  %785 = vmatmul.bf16.gmra.mxu0 %v2530_v34  ;;  %v135_v29 = vld [vmem:[#allocation2 + $0x30] sm:$0xff]  ;;  %v2092_v33 = vld [vmem:[#allocation7 + $0xe4] sm:$0xf]  ;;  %v1859_v38 = vor.u32 %v2142_v26, %v1856_v27  ;;  %v1760_v43 = vld [vmem:[#allocation7 + $0x1b8] sm:$0xf0]  ;;  %v2544_v45 = vpack.c.bf16 %v141_v28, %v134_v24 }
  0x50   :  { %852 = vmatpush.bf16.msrb.mxu0 %v1823_v30  ;;  %804 = vmatmul.bf16.gmra.mxu1 %v2532_v39  ;;  %v142_v30 = vld [vmem:[#allocation2 + $0x68] sm:$0xff]  ;;  %v2108_v36 = vld [vmem:[#allocation7 + $0x164] sm:$0xf]  ;;  %v2118_v42 = vld [vmem:[#allocation7 + $0x1b4] sm:$0xf] }
  0x51   :  { %871 = vmatpush.bf16.msrb.mxu1 %v1887_v35  ;;  %823 = vmatmul.bf16.gmra.mxu2 %v2534_v40  ;;  %v1656_v35 = vld [vmem:[#allocation7 + $0xe8] sm:$0xf0]  ;;  %v1723_v53 = vor.u32 %v2108_v36, %v1720_v41  ;;  %v1648_v56 = vld [vmem:[#allocation7 + $0xd8] sm:$0xf0]  ;;  %v2106_v57 = vld [vmem:[#allocation7 + $0x154] sm:$0xf]  ;;  %v1763_v58 = vor.u32 %v2118_v42, %v1760_v43 }
  0x52   :  { %842 = vmatmul.bf16.gmra.mxu3 %v2536_v44  ;;  %964 = vmatpush.bf16.msra.mxu2 %v1779_v13  ;;  %v1848_v49 = vld [vmem:[#allocation7 + $0x268] sm:$0xf0]  ;;  %v1659_v50 = vor.u32 %v2092_v33, %v1656_v35  ;;  %v1712_v60 = vld [vmem:[#allocation7 + $0x158] sm:$0xf0]  ;;  %v2116_v61 = vld [vmem:[#allocation7 + $0x1a4] sm:$0xf] }
  0x53   :  { %909 = vmatpush.bf16.msrb.mxu3 %v1571_v47  ;;  %v2546_v47 = vpack.c.bf16 %v142_v30, %v135_v29  ;;  %v1752_v62 = vld [vmem:[#allocation7 + $0x1a8] sm:$0xf0]  ;;  %v1715_v2 = vor.u32 %v2106_v57, %v1712_v60  ;;  %v2088_v3 = vld [vmem:[#allocation7 + $0xc4] sm:$0xf]  ;;  %v2114_v9 = vld [vmem:[#allocation7 + $0x194] sm:$0xf] }
  0x54   :  { %853 = vmatpush.bf16.msrb.mxu0 %v1815_v48  ;;  %v2140_v48 = vld [vmem:[#allocation7 + $0x264] sm:$0xf]  ;;  %v1755_v6 = vor.u32 %v2116_v61, %v1752_v62  ;;  %v1704_v8 = vld [vmem:[#allocation7 + $0x148] sm:$0xf0]  ;;  %v1744_v10 = vld [vmem:[#allocation7 + $0x198] sm:$0xf0] }
  0x55   :  { %872 = vmatpush.bf16.msrb.mxu1 %v1879_v54  ;;  %v2090_v54 = vld [vmem:[#allocation7 + $0xd4] sm:$0xf]  ;;  %v1851_v59 = vor.u32 %v2140_v48, %v1848_v49  ;;  %v2104_v5 = vld [vmem:[#allocation7 + $0x144] sm:$0xf]  ;;  %v1832_v12 = vld [vmem:[#allocation7 + $0x248] sm:$0xf0] }
  0x56   :  { %965 = vmatpush.bf16.msra.mxu2 %v1771_v31  ;;  %v1651_v1 = vor.u32 %v2090_v54, %v1648_v56  ;;  %v2136_v11 = vld [vmem:[#allocation7 + $0x244] sm:$0xf]  ;;  %v2086_v16 = vld [vmem:[#allocation7 + $0xb4] sm:$0xf]  ;;  %v1632_v17 = vld [vmem:[#allocation7 + $0xb8] sm:$0xf0] }
  0x57   :  { %910 = vmatpush.bf16.msrb.mxu3 %v1563_v63  ;;  %v2138_v63 = vld [vmem:[#allocation7 + $0x254] sm:$0xf]  ;;  %v1835_v20 = vor.u32 %v2136_v11, %v1832_v12  ;;  %v1696_v21 = vld [vmem:[#allocation7 + $0x138] sm:$0xf0]  ;;  %v2112_v22 = vld [vmem:[#allocation7 + $0x184] sm:$0xf]  ;;  %v1635_v30 = vor.u32 %v2086_v16, %v1632_v17 }
  0x58   :  { %854 = vmatpush.bf16.msrb.mxu0 %v1807_v0  ;;  %v1840_v0 = vld [vmem:[#allocation7 + $0x258] sm:$0xf0]  ;;  %v2102_v18 = vld [vmem:[#allocation7 + $0x134] sm:$0xf]  ;;  %v149_v28 = vld [vmem:[#allocation2 + $0xa0] sm:$0xff] }
  0x59   :  { %873 = vmatpush.bf16.msrb.mxu1 %v1871_v4  ;;  %v1640_v4 = vld [vmem:[#allocation7 + $0xc8] sm:$0xf0]  ;;  %v1843_v7 = vor.u32 %v2138_v63, %v1840_v0  ;;  %v148_v24 = vld [vmem:[#allocation2 + $0x98] sm:$0xff]  ;;  %v155_v27 = vld [vmem:[#allocation2 + $0xd0] sm:$0xff]  ;;  %v1699_v31 = vor.u32 %v2102_v18, %v1696_v21 }
  0x5a   :  { %966 = vmatpush.bf16.msra.mxu2 %v1763_v58  ;;  %v1643_v13 = vor.u32 %v2088_v3, %v1640_v4  ;;  %v1824_v26 = vld [vmem:[#allocation7 + $0x238] sm:$0xf0]  ;;  %v1624_v33 = vld [vmem:[#allocation7 + $0xa8] sm:$0xf0]  ;;  %v2100_v41 = vld [vmem:[#allocation7 + $0x124] sm:$0xf]  ;;  %v2555_v43 = vpack.c.bf16 %v155_v27, %v148_v24 }
  0x5b   :  { %911 = vmatpush.bf16.msrb.mxu3 %v1555_v14  ;;  %v147_v14 = vld [vmem:[#allocation2 + $0x90] sm:$0xff]  ;;  %v156_v29 = vld [vmem:[#allocation2 + $0xd8] sm:$0xff]  ;;  %v1688_v42 = vld [vmem:[#allocation7 + $0x128] sm:$0xf0] }
  0x5c   :  { %855 = vmatpush.bf16.msrb.mxu0 %v1799_v15  ;;  %v154_v15 = vld [vmem:[#allocation2 + $0xc8] sm:$0xff]  ;;  %v2557_v48 = vpack.c.bf16 %v156_v29, %v149_v28  ;;  %v2132_v49 = vld [vmem:[#allocation7 + $0x224] sm:$0xf]  ;;  %v1691_v54 = vor.u32 %v2100_v41, %v1688_v42  ;;  %v2082_v56 = vld [vmem:[#allocation7 + $0x94] sm:$0xf] }
  0x5d   :  { %874 = vmatpush.bf16.msrb.mxu1 %v1863_v19  ;;  %v1747_v19 = vor.u32 %v2114_v9, %v1744_v10  ;;  %v2553_v36 = vpack.c.bf16 %v154_v15, %v147_v14  ;;  %v1616_v57 = vld [vmem:[#allocation7 + $0x98] sm:$0xf0]  ;;  %v2130_v61 = vld [vmem:[#allocation7 + $0x214] sm:$0xf]  ;;  %v2080_v0 = vld [vmem:[#allocation7 + $0x84] sm:$0xf] }
  0x5e   :  { %967 = vmatpush.bf16.msra.mxu2 %v1755_v6  ;;  %v1680_v60 = vld [vmem:[#allocation7 + $0x118] sm:$0xf0]  ;;  %v1619_v63 = vor.u32 %v2082_v56, %v1616_v57  ;;  %v2096_v3 = vld [vmem:[#allocation7 + $0x104] sm:$0xf]  ;;  %v1672_v4 = vld [vmem:[#allocation7 + $0x108] sm:$0xf0] }
  0x5f   :  { %912 = vmatpush.bf16.msrb.mxu3 %v1547_v32  ;;  %856 = vmatmul.bf16.vlgmr.msrb.gmra.mxu0 %v2542_v37  ;;  %v2084_v32 = vld [vmem:[#allocation7 + $0xa4] sm:$0xf]  ;;  %v1808_v62 = vld [vmem:[#allocation7 + $0x218] sm:$0xf0]  ;;  %v1800_v9 = vld [vmem:[#allocation7 + $0x208] sm:$0xf0] }
  0x60   :  { %924 = vmatpush.bf16.msra.mxu0 %v1667_v23  ;;  %875 = vmatmul.bf16.vlgmr.msrb.gmra.mxu1 %v2544_v45  ;;  %v1736_v23 = vld [vmem:[#allocation7 + $0x188] sm:$0xf0]  ;;  %v2128_v6 = vld [vmem:[#allocation7 + $0x204] sm:$0xf]  ;;  %v2154_v18 = vld [vmem:[#allocation7 + $0x2d4] sm:$0xf] }
  0x61   :  { %943 = vmatpush.bf16.msra.mxu1 %v1731_v25  ;;  %1932 = vmatmul.msk.bf16.vlgmr.msrb.gmra.mxu2 %vm765_vm0, %v2546_v47  ;;  %v2134_v25 = vld [vmem:[#allocation7 + $0x234] sm:$0xf]  ;;  %v1739_v35 = vor.u32 %v2112_v22, %v1736_v23  ;;  %v2160_v10 = vld [vmem:[#allocation7 + $0x304] sm:$0xf]  ;;  %v1928_v11 = vld [vmem:[#allocation7 + $0x308] sm:$0xf0] }
  0x62   :  { %913 = vmatmul.bf16.vlgmr.msrb.gmra.mxu3 %v2518_v46  ;;  %v1707_v46 = vor.u32 %v2104_v5, %v1704_v8  ;;  %968 = vmatpush.bf16.msra.mxu2 %v1747_v19  ;;  %v1811_v5 = vor.u32 %v2130_v61, %v1808_v62  ;;  %v1920_v8 = vld [vmem:[#allocation7 + $0x2f8] sm:$0xf0]  ;;  %v1931_v14 = vor.u32 %v2160_v10, %v1928_v11  ;;  %v2156_v15 = vld [vmem:[#allocation7 + $0x2e4] sm:$0xf]  ;;  %v1912_v16 = vld [vmem:[#allocation7 + $0x2e8] sm:$0xf0] }
  0x63   :  { %981 = vmatpush.bf16.msra.mxu3 %v1859_v38  ;;  %v1827_v38 = vor.u32 %v2134_v25, %v1824_v26  ;;  %v1915_v17 = vor.u32 %v2156_v15, %v1912_v16  ;;  %v1904_v19 = vld [vmem:[#allocation7 + $0x2d8] sm:$0xf0]  ;;  %v2152_v21 = vld [vmem:[#allocation7 + $0x2c4] sm:$0xf]  ;;  %v1896_v22 = vld [vmem:[#allocation7 + $0x2c8] sm:$0xf0] }
  0x64   :  { %925 = vmatpush.bf16.msra.mxu0 %v1659_v50  ;;  %v1816_v50 = vld [vmem:[#allocation7 + $0x228] sm:$0xf0]  ;;  %v1899_v23 = vor.u32 %v2152_v21, %v1896_v22  ;;  %v2150_v24 = vld [vmem:[#allocation7 + $0x2b4] sm:$0xf]  ;;  %v1888_v25 = vld [vmem:[#allocation7 + $0x2b8] sm:$0xf0] }
  0x65   :  { %944 = vmatpush.bf16.msra.mxu1 %v1723_v53  ;;  %v1627_v53 = vor.u32 %v2084_v32, %v1624_v33  ;;  %v1819_v58 = vor.u32 %v2132_v49, %v1816_v50  ;;  %v1891_v26 = vor.u32 %v2150_v24, %v1888_v25  ;;  %v2148_v27 = vld [vmem:[#allocation7 + $0x2a4] sm:$0xf]  ;;  %v1880_v28 = vld [vmem:[#allocation7 + $0x2a8] sm:$0xf0]  ;;  %v2162_v56 = vld [vmem:[#allocation8] sm:$0xff] }
  0x66   :  { %969 = vmatpush.bf16.msra.mxu2 %v1739_v35  ;;  %v1883_v29 = vor.u32 %v2148_v27, %v1880_v28  ;;  %v2166_v35 = vld [vmem:[#allocation8 + $0x20] sm:$0xff]  ;;  %v2164_v42 = vld [vmem:[#allocation8 + $0x10] sm:$0xff] }
  0x67   :  { %982 = vmatpush.bf16.msra.mxu3 %v1851_v59  ;;  %v2098_v59 = vld [vmem:[#allocation7 + $0x114] sm:$0xf] }
  0x68   :  { %926 = vmatpush.bf16.msra.mxu0 %v1651_v1  ;;  %v1683_v1 = vor.u32 %v2098_v59, %v1680_v60 }
  0x69   :  { %945 = vmatpush.bf16.msra.mxu1 %v1715_v2  ;;  %v1608_v2 = vld [vmem:[#allocation7 + $0x88] sm:$0xf0] }
  0x6a   :  { %v1611_v12 = vor.u32 %v2080_v0, %v1608_v2 }
  0x6b   :  { %983 = vmatpush.bf16.msra.mxu3 %v1843_v7  ;;  %v2158_v7 = vld [vmem:[#allocation7 + $0x2f4] sm:$0xf] }
  0x6c   :  { %927 = vmatpush.bf16.msra.mxu0 %v1643_v13  ;;  %v1923_v13 = vor.u32 %v2158_v7, %v1920_v8 }
  0x6d   :  { %946 = vmatpush.bf16.msra.mxu1 %v1707_v46  ;;  %v1803_v46 = vor.u32 %v2128_v6, %v1800_v9  ;;  %v1046_v9 = vld [vmem:[#allocation5] sm:$0xff] }
  0x6f   :  { %984 = vmatpush.bf16.msra.mxu3 %v1835_v20  ;;  %861 = vmatmul.bf16.gmra.mxu0 %v2553_v36  ;;  %v1907_v20 = vor.u32 %v2154_v18, %v1904_v19 }
  0x70   :  { %928 = vmatpush.bf16.msra.mxu0 %v1635_v30  ;;  %880 = vmatmul.bf16.gmra.mxu1 %v2555_v43  ;;  %v2146_v30 = vld [vmem:[#allocation7 + $0x294] sm:$0xf] }
  0x71   :  { %947 = vmatpush.bf16.msra.mxu1 %v1699_v31  ;;  %1933 = vmatmul.msk.bf16.gmra.mxu2 %vm765_vm0, %v2557_v48 }
  0x72   :  { %918 = vmatmul.bf16.gmra.mxu3 %v2530_v34  ;;  %v1675_v34 = vor.u32 %v2096_v3, %v1672_v4 }
  0x73   :  { %985 = vmatpush.bf16.msra.mxu3 %v1827_v38 }
  0x74   :  { %929 = vmatpush.bf16.msra.mxu0 %v1627_v53 }
  0x75   :  { %948 = vmatpush.bf16.msra.mxu1 %v1691_v54  ;;  %v2581_v54 = vld [vmem:[%s2606_s3] sm:$0x3] }
  0x76   :  { %v271_v57 = vperm.slane %v2581_v54, 0 }
  0x77   :  { %986 = vmatpush.bf16.msra.mxu3 %v1819_v58 }
  0x78   :  { %930 = vmatpush.bf16.msra.mxu0 %v1619_v63 }
  0x79   :  { %949 = vmatpush.bf16.msra.mxu1 %v1683_v1 }
  0x7b   :  { %987 = vmatpush.bf16.msra.mxu3 %v1811_v5 }
  0x7c   :  { %931 = vmatpush.bf16.msra.mxu0 %v1611_v12  ;;  %v1048_v12 = vunpack.c.0.s8 %v1046_v9 }
  0x7d   :  { %950 = vmatpush.bf16.msra.mxu1 %v1675_v34 }
  0x7e   :  { %v1056_v18 = vcvt.s32.f32 %v1048_v12 }
  0x7f   :  { %988 = vmatpush.bf16.msra.mxu3 %v1803_v46  ;;  %932 = vmatmul.bf16.vlgmr.msra.gmra.mxu0 %v2520_v51  ;;  %v1872_v51 = vld [vmem:[#allocation7 + $0x298] sm:$0xf0]  ;;  %v1050_v46 = vunpack.c.1.s8 %v1046_v9 }
  0x80   :  { %1000 = vmatpush.bf16.msrb.mxu0 %v1923_v13  ;;  %951 = vmatmul.bf16.vlgmr.msra.gmra.mxu1 %v2522_v52  ;;  %v1875_v31 = vor.u32 %v2146_v30, %v1872_v51  ;;  %v2144_v52 = vld [vmem:[#allocation7 + $0x284] sm:$0xf]  ;;  %v1064_v25 = vmul.f32 1.25, %v1056_v18 }
  0x81   :  { %1026 = vmatpush.bf16.msrb.mxu1 %v1931_v14  ;;  %970 = vmatmul.bf16.vlgmr.msra.gmra.mxu2 %v2524_v55  ;;  %v1864_v55 = vld [vmem:[#allocation7 + $0x288] sm:$0xf0] }
  0x82   :  { %989 = vmatmul.bf16.vlgmr.msra.gmra.mxu3 %v2542_v37  ;;  %v1867_v37 = vor.u32 %v2144_v52, %v1864_v55 }
  0x84   :  { %1001 = vmatpush.bf16.msrb.mxu0 %v1915_v17 }
  0x88   :  { %1002 = vmatpush.bf16.msrb.mxu0 %v1907_v20  ;;  %v1058_v20 = vcvt.s32.f32 %v1050_v46  ;;  %v272_v46 = vperm.slane %v2581_v54, 1 }
  0x8a   :  { %v1066_v30 = vmul.f32 1.25, %v1058_v20 }
  0x8c   :  { %1003 = vmatpush.bf16.msrb.mxu0 %v1899_v23 }
  0x8f   :  { %937 = vmatmul.bf16.gmra.mxu0 %v2532_v39  ;;  %v2169_v39 = vld [vmem:[#allocation8 + $0x38] sm:$0xff] }
  0x90   :  { %1004 = vmatpush.bf16.msrb.mxu0 %v1891_v26  ;;  %956 = vmatmul.bf16.gmra.mxu1 %v2534_v40  ;;  %v2168_v40 = vld [vmem:[#allocation8 + $0x30] sm:$0xff] }
  0x91   :  { %975 = vmatmul.bf16.gmra.mxu2 %v2536_v44  ;;  %v2167_v44 = vld [vmem:[#allocation8 + $0x28] sm:$0xff] }
  0x92   :  { %994 = vmatmul.bf16.gmra.mxu3 %v2553_v36  ;;  %1216 = vmatpush.bf16.msrb.mxu2 %v2169_v39 }
  0x94   :  { %1005 = vmatpush.bf16.msrb.mxu0 %v1883_v29 }
  0x96   :  { %1217 = vmatpush.bf16.msrb.mxu2 %v2168_v40 }
  0x98   :  { %1006 = vmatpush.bf16.msrb.mxu0 %v1875_v31 }
  0x9a   :  { %1218 = vmatpush.bf16.msrb.mxu2 %v2167_v44 }
  0x9c   :  { %1007 = vmatpush.bf16.msrb.mxu0 %v1867_v37  ;;  %v2177_v37 = vld [vmem:[#allocation8 + $0x78] sm:$0xff] }
  0x9d   :  { %1235 = vmatpush.bf16.msrb.mxu3 %v2177_v37 }
  0x9e   :  { %1219 = vmatpush.bf16.msrb.mxu2 %v2166_v35 }
  0x9f   :  { %1008 = vmatmul.bf16.vlgmr.msrb.gmra.mxu0 %v2544_v45  ;;  %v2165_v45 = vld [vmem:[#allocation8 + $0x18] sm:$0xff] }
  0xa0   :  { %1934 = vmatmul.msk.bf16.vlgmr.msrb.gmra.mxu1 %vm765_vm0, %v2546_v47 }
  0xa2   :  { %1220 = vmatpush.bf16.msrb.mxu2 %v2165_v45  ;;  %v2176_v45 = vld [vmem:[#allocation8 + $0x70] sm:$0xff] }
  0xa3   :  { %1236 = vmatpush.bf16.msrb.mxu3 %v2176_v45 }
  0xa6   :  { %1221 = vmatpush.bf16.msrb.mxu2 %v2164_v42 }
  0xaf   :  { %1013 = vmatmul.bf16.gmra.mxu0 %v2555_v43 }
  0xb0   :  { %1935 = vmatmul.msk.bf16.gmra.mxu1 %vm765_vm0, %v2557_v48  ;;  %v2163_v48 = vld [vmem:[#allocation8 + $0x8] sm:$0xff] }
  0xb1   :  { %1222 = vmatpush.bf16.msrb.mxu2 %v2163_v48 }
  0xb5   :  { %1223 = vmatpush.bf16.msrb.mxu2 %v2162_v56 }
  0xbc   :  { %v781_v32 = vpop.f32.mrf.mxu0 }
  0xbd   :  { %v800_v33 = vpop.f32.mrf.mxu1  ;;  %v782_v61 = vadd.f32 %v781_v32, %v271_v57 }
  0xbf   :  { %v801_v63 = vadd.f32 %v800_v33, %v782_v61  ;;  %v2174_v61 = vld [vmem:[#allocation8 + $0x60] sm:$0xff] }
  0xc4   :  { %v819_v36 = vpop.f32.mrf.mxu2  ;;  %v783_v38 = vpop.f32.mrf.mxu0 }
  0xc5   :  { %v838_v41 = vpop.f32.mrf.mxu3  ;;  %v802_v47 = vpop.f32.mrf.mxu1  ;;  %v784_v0 = vadd.f32 %v783_v38, %v271_v57  ;;  %v820_v2 = vadd.f32 %v819_v36, %v801_v63 }
  0xc7   :  { %v803_v5 = vadd.f32 %v802_v47, %v784_v0  ;;  %v839_v6 = vadd.f32 %v838_v41, %v820_v2  ;;  %v1052_v47 = vunpack.c.2.s8 %v1046_v9 }
  0xcc   :  { %v821_v43 = vpop.f32.mrf.mxu2  ;;  %v786_v49 = vpop.f32.mrf.mxu0 }
  0xcd   :  { %v840_v50 = vpop.f32.mrf.mxu3  ;;  %v805_v53 = vpop.f32.mrf.mxu1  ;;  %v822_v7 = vadd.f32 %v821_v43, %v803_v5  ;;  %v787_v15 = vadd.f32 %v786_v49, %v271_v57  ;;  %v1054_v43 = vunpack.c.3.s8 %v1046_v9 }
  0xcf   :  { %v841_v34 = vadd.f32 %v840_v50, %v822_v7  ;;  %v806_v21 = vadd.f32 %v805_v53, %v787_v15  ;;  %v2175_v53 = vld [vmem:[#allocation8 + $0x68] sm:$0xff] }
  0xd0   :  { %1237 = vmatpush.bf16.msrb.mxu3 %v2175_v53 }
  0xd4   :  { %v824_v58 = vpop.f32.mrf.mxu2  ;;  %v788_v59 = vpop.f32.mrf.mxu0  ;;  %1238 = vmatpush.bf16.msrb.mxu3 %v2174_v61 }
  0xd5   :  { %v807_v60 = vpop.f32.mrf.mxu1  ;;  %v843_v62 = vpop.f32.mrf.mxu3  ;;  %v789_v22 = vadd.f32 %v788_v59, %v271_v57  ;;  %v825_v27 = vadd.f32 %v824_v58, %v806_v21  ;;  %v1060_v57 = vcvt.s32.f32 %v1052_v47  ;;  %v1062_v58 = vcvt.s32.f32 %v1054_v43 }
  0xd7   :  { %v808_v52 = vadd.f32 %v807_v60, %v789_v22  ;;  %v844_v39 = vadd.f32 %v843_v62, %v825_v27  ;;  %v1068_v63 = vmul.f32 1.25, %v1060_v57 }
  0xdc   :  { %v826_v1 = vpop.f32.mrf.mxu2  ;;  %v857_v3 = vpop.f32.mrf.mxu0 }
  0xdd   :  { %v876_v4 = vpop.f32.mrf.mxu1  ;;  %v845_v8 = vpop.f32.mrf.mxu3  ;;  %v858_v10 = vadd.f32 %v857_v3, %v839_v6  ;;  %v827_v40 = vadd.f32 %v826_v1, %v808_v52  ;;  %v1070_v1 = vmul.f32 1.25, %v1062_v58  ;;  %v2173_v6 = vld [vmem:[#allocation8 + $0x58] sm:$0xff] }
  0xde   :  { %1239 = vmatpush.bf16.msrb.mxu3 %v2173_v6 }
  0xdf   :  { %v877_v16 = vadd.f32 %v876_v4, %v858_v10  ;;  %v846_v38 = vadd.f32 %v845_v8, %v827_v40  ;;  %v2172_v10 = vld [vmem:[#allocation8 + $0x50] sm:$0xff] }
  0xe2   :  { %1240 = vmatpush.bf16.msrb.mxu3 %v2172_v10 }
  0xe4   :  { %v895_v11 = vpop.f32.mrf.mxu2  ;;  %v859_v13 = vpop.f32.mrf.mxu0 }
  0xe5   :  { %v878_v14 = vpop.f32.mrf.mxu1  ;;  %v860_v17 = vadd.f32 %v859_v13, %v841_v34  ;;  %v896_v19 = vadd.f32 %v895_v11, %v877_v16  ;;  %v2584_v24 = vpop.f32.mrf.mxu3  ;;  %v2171_v34 = vld [vmem:[#allocation8 + $0x48] sm:$0xff] }
  0xe6   :  { %1241 = vmatpush.bf16.msrb.mxu3 %v2171_v34  ;;  %v915_v18 = vadd.f32 %v2584_v24, %v272_v46 }
  0xe7   :  { %v879_v23 = vadd.f32 %v878_v14, %v860_v17  ;;  %v1038_v28 = vmax.f32 %v896_v19, 0.0  ;;  %v2170_v14 = vld [vmem:[#allocation8 + $0x40] sm:$0xff] }
  0xe9   :  { %v1072_v44 = vmul.f32 %v1064_v25, %v1038_v28 }
  0xea   :  { %1242 = vmatpush.bf16.msrb.mxu3 %v2170_v14 }
  0xec   :  { %v897_v26 = vpop.f32.mrf.mxu2  ;;  %v862_v51 = vpop.f32.mrf.mxu0 }
  0xed   :  { %v898_v29 = vadd.f32 %v897_v26, %v879_v23  ;;  %v881_v31 = vpop.f32.mrf.mxu1  ;;  %v863_v35 = vadd.f32 %v862_v51, %v844_v39  ;;  %v916_v41 = vpop.f32.mrf.mxu3 }
  0xee   :  { %v917_v23 = vadd.f32 %v916_v41, %v272_v46 }
  0xef   :  { %v1040_v55 = vmax.f32 %v898_v29, 0.0  ;;  %v882_v49 = vadd.f32 %v881_v31, %v863_v35  ;;  %v1047_v29 = vld [vmem:[#allocation5 + $0x8] sm:$0xff] }
  0xf0   :  { %v1051_v24 = vunpack.c.1.s8 %v1047_v29  ;;  %v1053_v6 = vunpack.c.2.s8 %v1047_v29 }
  0xf1   :  { %v1074_v32 = vmul.f32 %v1066_v30, %v1040_v55  ;;  %v1049_v55 = vunpack.c.0.s8 %v1047_v29 }
  0xf2   :  { %v1059_v45 = vcvt.s32.f32 %v1051_v24 }
  0xf3   :  { %v1080_v33 = vpack.c.bf16 %v1074_v32, %v1072_v44  ;;  %v1057_v32 = vcvt.s32.f32 %v1049_v55 }
  0xf4   :  { %v900_v36 = vpop.f32.mrf.mxu2  ;;  %v864_v42 = vpop.f32.mrf.mxu0 }
  0xf5   :  { %1224 = vmatmul.bf16.vlgmr.msrb.gmra.mxu2 %v1080_v33  ;;  %v883_v48 = vpop.f32.mrf.mxu1  ;;  %v865_v50 = vadd.f32 %v864_v42, %v846_v38  ;;  %v901_v56 = vadd.f32 %v900_v36, %v882_v49  ;;  %v919_v4 = vpop.f32.mrf.mxu3 }
  0xf6   :  { %v920_v37 = vadd.f32 %v919_v4, %v272_v46 }
  0xf7   :  { %v884_v59 = vadd.f32 %v883_v48, %v865_v50  ;;  %v1042_v62 = vmax.f32 %v901_v56, 0.0  ;;  %v1065_v48 = vmul.f32 1.25, %v1057_v32  ;;  %v1067_v56 = vmul.f32 1.25, %v1059_v45  ;;  %v2191_v45 = vld [vmem:[#allocation11 + $0x28] sm:$0xff] }
  0xf9   :  { %v1076_v7 = vmul.f32 %v1068_v63, %v1042_v62 }
  0xfc   :  { %v902_v60 = vpop.f32.mrf.mxu2  ;;  %v933_v2 = vpop.f32.mrf.mxu0 }
  0xfd   :  { %v903_v0 = vadd.f32 %v902_v60, %v884_v59  ;;  %v952_v3 = vpop.f32.mrf.mxu1  ;;  %v921_v13 = vpop.f32.mrf.mxu3  ;;  %v934_v20 = vadd.f32 %v933_v2, %v915_v18 }
  0xfe   :  { %v922_v42 = vadd.f32 %v921_v13, %v272_v46 }
  0xff   :  { %v1044_v5 = vmax.f32 %v903_v0, 0.0  ;;  %v953_v25 = vadd.f32 %v952_v3, %v934_v20 }
 0x101   :  { %v1078_v8 = vmul.f32 %v1070_v1, %v1044_v5 }
 0x103   :  { %v1082_v9 = vpack.c.bf16 %v1078_v8, %v1076_v7  ;;  %v1055_v7 = vunpack.c.3.s8 %v1047_v29  ;;  %v2179_v29 = vld [vmem:[#allocation10 + $0x8] sm:$0xff] }
 0x104   :  { %v935_v11 = vpop.f32.mrf.mxu0  ;;  %v971_v17 = vpop.f32.mrf.mxu2 }
 0x105   :  { %1229 = vmatmul.bf16.gmra.mxu2 %v1082_v9  ;;  %v954_v12 = vpop.f32.mrf.mxu1  ;;  %v990_v19 = vpop.f32.mrf.mxu3  ;;  %v972_v27 = vadd.f32 %v971_v17, %v953_v25  ;;  %v936_v28 = vadd.f32 %v935_v11, %v917_v23  ;;  %v1061_v11 = vcvt.s32.f32 %v1053_v6  ;;  %v2184_v23 = vld [vmem:[#allocation10 + $0x30] sm:$0xff]  ;;  %v2183_v25 = vld [vmem:[#allocation10 + $0x28] sm:$0xff] }
 0x107   :  { %v955_v54 = vadd.f32 %v954_v12, %v936_v28  ;;  %v991_v31 = vadd.f32 %v990_v19, %v972_v27  ;;  %v1063_v12 = vcvt.s32.f32 %v1055_v7  ;;  %v2181_v27 = vld [vmem:[#allocation10 + $0x18] sm:$0xff]  ;;  %v2180_v28 = vld [vmem:[#allocation10 + $0x10] sm:$0xff] }
 0x109   :  { %v1071_v17 = vmul.f32 1.25, %v1063_v12  ;;  %v2189_v12 = vld [vmem:[#allocation11 + $0x18] sm:$0xff] }
 0x10c   :  { %v938_v15 = vpop.f32.mrf.mxu0  ;;  %v973_v26 = vpop.f32.mrf.mxu2 }
 0x10d   :  { %v957_v16 = vpop.f32.mrf.mxu1  ;;  %v992_v30 = vpop.f32.mrf.mxu3  ;;  %v974_v39 = vadd.f32 %v973_v26, %v955_v54  ;;  %v939_v33 = vadd.f32 %v938_v15, %v920_v37  ;;  %v1069_v15 = vmul.f32 1.25, %v1061_v11  ;;  %v2182_v26 = vld [vmem:[#allocation10 + $0x20] sm:$0xff] }
 0x10e   :  { %v1258_v54 = vld [vmem:[#allocation5 + $0x10] sm:$0xff] }
 0x10f   :  { %v993_v35 = vadd.f32 %v992_v30, %v974_v39  ;;  %v958_v49 = vadd.f32 %v957_v16, %v939_v33  ;;  %v2178_v30 = vld [vmem:[#allocation10] sm:$0xff]  ;;  %v1259_v37 = vunpack.c.0.s8 %v1258_v54  ;;  %v1260_v39 = vunpack.c.1.s8 %v1258_v54 }
 0x111   :  { %v1263_v33 = vcvt.s32.f32 %v1259_v37 }
 0x114   :  { %v940_v21 = vpop.f32.mrf.mxu0  ;;  %v976_v44 = vpop.f32.mrf.mxu2 }
 0x115   :  { %v959_v22 = vpop.f32.mrf.mxu1  ;;  %v995_v43 = vpop.f32.mrf.mxu3  ;;  %v977_v57 = vadd.f32 %v976_v44, %v958_v49  ;;  %v941_v58 = vadd.f32 %v940_v21, %v922_v42  ;;  %v2192_v44 = vld [vmem:[#allocation11 + $0x30] sm:$0xff] }
 0x117   :  { %v960_v0 = vadd.f32 %v959_v22, %v941_v58  ;;  %v996_v1 = vadd.f32 %v995_v43, %v977_v57  ;;  %v2185_v22 = vld [vmem:[#allocation10 + $0x38] sm:$0xff] }
 0x118   :  { %1345 = vmatpush.bf16.msra.mxu0 %v2185_v22  ;;  %2194 = vmatpush.bf16.msra.mxu2 %v2185_v22 }
 0x11c   :  { %v1009_v51 = vpop.f32.mrf.mxu0  ;;  %v978_v62 = vpop.f32.mrf.mxu2  ;;  %1346 = vmatpush.bf16.msra.mxu0 %v2184_v23  ;;  %2195 = vmatpush.bf16.msra.mxu2 %v2184_v23 }
 0x11d   :  { %v1028_v52 = vpop.f32.mrf.mxu1  ;;  %v1010_v40 = vadd.f32 %v1009_v51, %v991_v31  ;;  %v979_v4 = vadd.f32 %v978_v62, %v960_v0  ;;  %v997_v8 = vpop.f32.mrf.mxu3  ;;  %v2223_v31 = vld [vmem:[%s2608_s5] ss:$0 sm:$0xff] }
 0x11f   :  { %v1029_v36 = vadd.f32 %v1028_v52, %v1010_v40  ;;  %v998_v9 = vadd.f32 %v997_v8, %v979_v4  ;;  %v2193_v40 = vld [vmem:[#allocation11 + $0x38] sm:$0xff] }
 0x120   :  { %1347 = vmatpush.bf16.msra.mxu0 %v2183_v25  ;;  %2196 = vmatpush.bf16.msra.mxu2 %v2183_v25 }
 0x121   :  { %v1039_v50 = vmax.f32 %v1029_v36, 0.0  ;;  %1455 = vmatpush.bf16.msra.mxu1 %v2193_v40  ;;  %2202 = vmatpush.bf16.msra.mxu3 %v2193_v40 }
 0x123   :  { %v1073_v60 = vmul.f32 %v1065_v48, %v1039_v50  ;;  %v2190_v50 = vld [vmem:[#allocation11 + $0x20] sm:$0xff] }
 0x124   :  { %v1011_v38 = vpop.f32.mrf.mxu0  ;;  %1348 = vmatpush.bf16.msra.mxu0 %v2182_v26  ;;  %2197 = vmatpush.bf16.msra.mxu2 %v2182_v26 }
 0x125   :  { %v1012_v41 = vadd.f32 %v1011_v38, %v993_v35  ;;  %v1030_v47 = vpop.f32.mrf.mxu1  ;;  %v1264_v35 = vcvt.s32.f32 %v1260_v39  ;;  %1456 = vmatpush.bf16.msra.mxu1 %v2192_v44  ;;  %2203 = vmatpush.bf16.msra.mxu3 %v2192_v44 }
 0x127   :  { %v1031_v53 = vadd.f32 %v1030_v47, %v1012_v41  ;;  %v1267_v47 = vmul.f32 1.25, %v1263_v33  ;;  %v1268_v43 = vmul.f32 1.25, %v1264_v35 }
 0x128   :  { %1349 = vmatpush.bf16.msra.mxu0 %v2181_v27  ;;  %2198 = vmatpush.bf16.msra.mxu2 %v2181_v27 }
 0x129   :  { %v1041_v59 = vmax.f32 %v1031_v53, 0.0  ;;  %1457 = vmatpush.bf16.msra.mxu1 %v2191_v45  ;;  %2204 = vmatpush.bf16.msra.mxu3 %v2191_v45 }
 0x12b   :  { %v1075_v61 = vmul.f32 %v1067_v56, %v1041_v59  ;;  %v1261_v59 = vunpack.c.2.s8 %v1258_v54 }
 0x12c   :  { %v1014_v63 = vpop.f32.mrf.mxu0  ;;  %1350 = vmatpush.bf16.msra.mxu0 %v2180_v28  ;;  %2199 = vmatpush.bf16.msra.mxu2 %v2180_v28 }
 0x12d   :  { %v1081_v2 = vpack.c.bf16 %v1075_v61, %v1073_v60  ;;  %v1033_v3 = vpop.f32.mrf.mxu1  ;;  %v1015_v5 = vadd.f32 %v1014_v63, %v996_v1  ;;  %1458 = vmatpush.bf16.msra.mxu1 %v2190_v50  ;;  %2205 = vmatpush.bf16.msra.mxu3 %v2190_v50  ;;  %v1262_v60 = vunpack.c.3.s8 %v1258_v54  ;;  %v1265_v0 = vcvt.s32.f32 %v1261_v59 }
 0x12f   :  { %1243 = vmatmul.bf16.vlgmr.msrb.gmra.mxu3 %v1081_v2  ;;  %v1034_v10 = vadd.f32 %v1033_v3, %v1015_v5  ;;  %v1266_v1 = vcvt.s32.f32 %v1262_v60  ;;  %v1269_v5 = vmul.f32 1.25, %v1265_v0 }
 0x130   :  { %1351 = vmatpush.bf16.msra.mxu0 %v2179_v29  ;;  %2200 = vmatpush.bf16.msra.mxu2 %v2179_v29 }
 0x131   :  { %v1043_v14 = vmax.f32 %v1034_v10, 0.0  ;;  %v1270_v7 = vmul.f32 1.25, %v1266_v1  ;;  %1459 = vmatpush.bf16.msra.mxu1 %v2189_v12  ;;  %2206 = vmatpush.bf16.msra.mxu3 %v2189_v12 }
 0x133   :  { %v1077_v19 = vmul.f32 %v1069_v15, %v1043_v14  ;;  %v1368_v14 = vld [vmem:[#allocation5 + $0x18] sm:$0xff] }
 0x134   :  { %v1016_v34 = vpop.f32.mrf.mxu0  ;;  %1352 = vmatpush.bf16.msra.mxu0 %v2178_v30  ;;  %2201 = vmatpush.bf16.msra.mxu2 %v2178_v30 }
 0x135   :  { %v1017_v13 = vadd.f32 %v1016_v34, %v998_v9  ;;  %v1035_v46 = vpop.f32.mrf.mxu1  ;;  %v2188_v34 = vld [vmem:[#allocation11 + $0x10] sm:$0xff] }
 0x136   :  { %1460 = vmatpush.bf16.msra.mxu1 %v2188_v34  ;;  %2207 = vmatpush.bf16.msra.mxu3 %v2188_v34 }
 0x137   :  { %v1036_v16 = vadd.f32 %v1035_v46, %v1017_v13  ;;  %v2187_v13 = vld [vmem:[#allocation11 + $0x8] sm:$0xff]  ;;  %v2186_v46 = vld [vmem:[#allocation11] sm:$0xff] }
 0x139   :  { %v1045_v18 = vmax.f32 %v1036_v16, 0.0  ;;  %v2224_v16 = vld [vmem:[%s2610_s7] ss:$0 sm:$0xff] }
 0x13a   :  { %1461 = vmatpush.bf16.msra.mxu1 %v2187_v13  ;;  %2208 = vmatpush.bf16.msra.mxu3 %v2187_v13 }
 0x13b   :  { %v1079_v20 = vmul.f32 %v1071_v17, %v1045_v18  ;;  %v1369_v17 = vunpack.c.0.s8 %v1368_v14  ;;  %v1370_v18 = vunpack.c.1.s8 %v1368_v14 }
 0x13d   :  { %v1083_v21 = vpack.c.bf16 %v1079_v20, %v1077_v19  ;;  %v1373_v20 = vcvt.s32.f32 %v1369_v17 }
 0x13e   :  { %1462 = vmatpush.bf16.msra.mxu1 %v2186_v46  ;;  %2209 = vmatpush.bf16.msra.mxu3 %v2186_v46 }
 0x13f   :  { %1248 = vmatmul.bf16.gmra.mxu3 %v1083_v21  ;;  %v1374_v21 = vcvt.s32.f32 %v1370_v18  ;;  %v1377_v25 = vmul.f32 1.25, %v1373_v20 }
 0x141   :  { %v1378_v27 = vmul.f32 1.25, %v1374_v21 }
 0x178   :  { %v1225_v51 = vpop.f32.mrf.mxu2 }
 0x179   :  { %v1226_v24 = vadd.f32 %v2223_v31, %v1225_v51 }
 0x180   :  { %v1227_v52 = vpop.f32.mrf.mxu2 }
 0x181   :  { %v1228_v36 = vadd.f32 %v2223_v31, %v1227_v52  ;;  %v1372_v52 = vunpack.c.3.s8 %v1368_v14 }
 0x183   :  { %v1376_v39 = vcvt.s32.f32 %v1372_v52 }
 0x185   :  { %v1380_v33 = vmul.f32 1.25, %v1376_v39 }
 0x188   :  { %v1230_v48 = vpop.f32.mrf.mxu2 }
 0x189   :  { %v1231_v61 = vadd.f32 %v2223_v31, %v1230_v48 }
 0x190   :  { %v1232_v62 = vpop.f32.mrf.mxu2 }
 0x191   :  { %v1233_v2 = vadd.f32 %v2223_v31, %v1232_v62  ;;  %v1371_v31 = vunpack.c.2.s8 %v1368_v14 }
 0x193   :  { %v1375_v37 = vcvt.s32.f32 %v1371_v31 }
 0x195   :  { %v1379_v44 = vmul.f32 1.25, %v1375_v37 }
 0x1b2   :  { %v1244_v55 = vpop.f32.mrf.mxu3 }
 0x1b3   :  { %v1245_v32 = vadd.f32 %v1244_v55, %v1226_v24 }
 0x1b5   :  { %v1254_v41 = vmax.f32 %v1245_v32, 0.0 }
 0x1b7   :  { %v1271_v53 = vmul.f32 %v1267_v47, %v1254_v41  ;;  %v2225_v41 = vld [vmem:[%s2612_s9] ss:$0 sm:$0xff]  ;;  %s2432_s9 = smov [#allocation13]  }
 0x1b8   :  { %s1522_s27 = sshll.u32 %s2432_s9, 4  ;;  %s1523_s27 = int_to_ptr.vmem [resolvable:$true] %s1522_s27 }
 0x1ba   :  { %v1246_v38 = vpop.f32.mrf.mxu3 }
 0x1bb   :  { %v1247_v42 = vadd.f32 %v1246_v38, %v1228_v36 }
 0x1bd   :  { %v1255_v49 = vmax.f32 %v1247_v42, 0.0 }
 0x1bf   :  { %v1272_v56 = vmul.f32 %v1268_v43, %v1255_v49 }
 0x1c1   :  { %v1275_v57 = vpack.c.bf16 %v1272_v56, %v1271_v53 }
 0x1c2   :  { %v1249_v58 = vpop.f32.mrf.mxu3 }
 0x1c3   :  { %1353 = vmatmul.bf16.vlgmr.msra.gmra.mxu0 %v1275_v57  ;;  %v1250_v63 = vadd.f32 %v1249_v58, %v1231_v61 }
 0x1c5   :  { %v1256_v4 = vmax.f32 %v1250_v63, 0.0 }
 0x1c7   :  { %v1273_v9 = vmul.f32 %v1269_v5, %v1256_v4 }
 0x1ca   :  { %v1251_v3 = vpop.f32.mrf.mxu3 }
 0x1cb   :  { %v1252_v6 = vadd.f32 %v1251_v3, %v1233_v2 }
 0x1cd   :  { %v1257_v8 = vmax.f32 %v1252_v6, 0.0 }
 0x1cf   :  { %v1274_v10 = vmul.f32 %v1270_v7, %v1257_v8 }
 0x1d1   :  { %v1276_v11 = vpack.c.bf16 %v1274_v10, %v1273_v9 }
 0x1d3   :  { %1358 = vmatmul.bf16.vlgmr.msra.gmra.mxu2 %v1276_v11 }
 0x240   :  { %v1354_v15 = vpop.f32.mrf.mxu0 }
 0x241   :  { %v1355_v19 = vadd.f32 %v2224_v16, %v1354_v15 }
 0x243   :  { %v1364_v23 = vmax.f32 %v1355_v19, 0.0 }
 0x245   :  { %v1381_v29 = vmul.f32 %v1377_v25, %v1364_v23 }
 0x248   :  { %v1356_v22 = vpop.f32.mrf.mxu0 }
 0x249   :  { %v1357_v26 = vadd.f32 %v2224_v16, %v1356_v22 }
 0x24b   :  { %v1365_v28 = vmax.f32 %v1357_v26, 0.0 }
 0x24d   :  { %v1382_v30 = vmul.f32 %v1378_v27, %v1365_v28 }
 0x24f   :  { %v1385_v51 = vpack.c.bf16 %v1382_v30, %v1381_v29 }
 0x251   :  { %1463 = vmatmul.bf16.vlgmr.msra.gmra.mxu1 %v1385_v51 }
 0x256   :  { %v1359_v54 = vpop.f32.mrf.mxu2 }
 0x257   :  { %v1360_v55 = vadd.f32 %v2224_v16, %v1359_v54 }
 0x259   :  { %v1366_v24 = vmax.f32 %v1360_v55, 0.0 }
 0x25b   :  { %v1383_v36 = vmul.f32 %v1379_v44, %v1366_v24 }
 0x25e   :  { %v1361_v40 = vpop.f32.mrf.mxu2 }
 0x25f   :  { %v1362_v32 = vadd.f32 %v2224_v16, %v1361_v40 }
 0x261   :  { %v1367_v35 = vmax.f32 %v1362_v32, 0.0 }
 0x263   :  { %v1384_v45 = vmul.f32 %v1380_v33, %v1367_v35 }
 0x265   :  { %v1386_v38 = vpack.c.bf16 %v1384_v45, %v1383_v36 }
 0x267   :  { %1468 = vmatmul.bf16.vlgmr.msra.gmra.mxu3 %v1386_v38 }
 0x2ce   :  { %v1464_v47 = vpop.f32.mrf.mxu1 }
 0x2cf   :  { %v1465_v42 = vadd.f32 %v2225_v41, %v1464_v47 }
 0x2d1   :  { %1474 = vmax.xlane.f32.xlu0 %v1465_v42 }
 0x2d6   :  { %v1466_v43 = vpop.f32.mrf.mxu1 }
 0x2d7   :  { %v1467_v48 = vadd.f32 %v2225_v41, %v1466_v43 }
 0x2d9   :  { %1476 = vmax.xlane.f32.xlu0 %v1467_v48 }
 0x2ea   :  { %v1469_v49 = vpop.f32.mrf.mxu3 }
 0x2eb   :  { %v1470_v50 = vadd.f32 %v2225_v41, %v1469_v49 }
 0x2ed   :  { %1478 = vmax.xlane.f32.xlu1 %v1470_v50 }
 0x2f2   :  { %v1471_v53 = vpop.f32.mrf.mxu3 }
 0x2f3   :  { %v1472_v56 = vadd.f32 %v2225_v41, %v1471_v53 }
 0x2f5   :  { %1480 = vmax.xlane.f32.xlu1 %v1472_v56 }
 0x344   :  { %v1475_v57 = vpop.xlane.xlu0 %1474 }
 0x345   :  { %v1482_v58 = vsub.f32 %v1465_v42, %v1475_v57 }
 0x347   :  { %v1486_v59 = vmul.f32 1.442695, %v1482_v58 }
 0x349   :  { %2226 = vpow2.f32 %v1486_v59 }
 0x34c   :  { %v1477_v60 = vpop.xlane.xlu0 %1476 }
 0x34d   :  { %v1483_v61 = vsub.f32 %v1467_v48, %v1477_v60 }
 0x34f   :  { %v2227_v62 = vpop.eup %2226  ;;  %v1488_v63 = vmul.f32 1.442695, %v1483_v61 }
 0x350   :  { %1494 = vadd.xlane.f32.xlu2 %v2227_v62 }
 0x351   :  { %2228 = vpow2.f32 %v1488_v63 }
 0x357   :  { %v2229_v0 = vpop.eup %2228 }
 0x358   :  { %1496 = vadd.xlane.f32.xlu2 %v2229_v0 }
 0x360   :  { %v1479_v1 = vpop.xlane.xlu1 %1478 }
 0x361   :  { %v1484_v2 = vsub.f32 %v1470_v50, %v1479_v1 }
 0x363   :  { %v1490_v3 = vmul.f32 1.442695, %v1484_v2 }
 0x365   :  { %2230 = vpow2.f32 %v1490_v3 }
 0x368   :  { %v1481_v4 = vpop.xlane.xlu1 %1480 }
 0x369   :  { %v1485_v5 = vsub.f32 %v1472_v56, %v1481_v4 }
 0x36b   :  { %v2231_v6 = vpop.eup %2230  ;;  %v1492_v7 = vmul.f32 1.442695, %v1485_v5 }
 0x36c   :  { %1498 = vadd.xlane.f32.xlu0 %v2231_v6 }
 0x36d   :  { %2232 = vpow2.f32 %v1492_v7 }
 0x373   :  { %v2233_v8 = vpop.eup %2232 }
 0x374   :  { %1500 = vadd.xlane.f32.xlu1 %v2233_v8 }
 0x3c3   :  { %v1495_v9 = vpop.xlane.xlu2 %1494 }
 0x3c4   :  { %2234 = vlog2.f32 %v1495_v9 }
 0x3ca   :  { %v2235_v10 = vpop.eup %2234 }
 0x3cb   :  { %v1503_v11 = vmul.f32 0.6931472, %v2235_v10  ;;  %v1497_v12 = vpop.xlane.xlu2 %1496 }
 0x3cc   :  { %2236 = vlog2.f32 %v1497_v12 }
 0x3cd   :  { %v1510_v34 = vsub.f32 %v1482_v58, %v1503_v11 }
 0x3cf   :  { %1514 = vst [vmem:[#allocation13] sm:$0xff] %v1510_v34 }
 0x3d2   :  { %v2237_v13 = vpop.eup %2236 }
 0x3d3   :  { %v1505_v46 = vmul.f32 0.6931472, %v2237_v13 }
 0x3d5   :  { %v1511_v14 = vsub.f32 %v1483_v61, %v1505_v46 }
 0x3d7   :  { %1515 = vst [vmem:[#allocation13 + $0x8] sm:$0xff] %v1511_v14 }
 0x3df   :  { %v1499_v15 = vpop.xlane.xlu0 %1498 }
 0x3e0   :  { %2238 = vlog2.f32 %v1499_v15 }
 0x3e6   :  { %v2239_v16 = vpop.eup %2238 }
 0x3e7   :  { %v1507_v17 = vmul.f32 0.6931472, %v2239_v16  ;;  %v1501_v18 = vpop.xlane.xlu1 %1500 }
 0x3e8   :  { %2240 = vlog2.f32 %v1501_v18 }
 0x3e9   :  { %v1512_v19 = vsub.f32 %v1484_v2, %v1507_v17 }
 0x3eb   :  { %1516 = vst [vmem:[#allocation13 + $0x10] sm:$0xff] %v1512_v19 }
 0x3ee   :  { %v2241_v20 = vpop.eup %2240 }
 0x3ef   :  { %v1509_v21 = vmul.f32 0.6931472, %v2241_v20 }
 0x3f1   :  { %v1513_v22 = vsub.f32 %v1485_v5, %v1509_v21 }
 0x3f3   :  { %1517 = vst [vmem:[#allocation13 + $0x18] sm:$0xff] %v1513_v22 }
 0x3f4   :  { %1530 = dma.vmem_to_hbm [thread:$0]  %s1523_s27, 512, %s1525_s29, [#allocation4], %s2428_s15, %s2428_s15, %s2429_s16  }
 0x3f5   :  { %2418 = dma.done.wait [#allocation4], 512  }
 0x3f6   :  { %2419 = vsyncadd [#allocation4], 4294966784 }
 0x3f7   :  { %1535 = vsyncpa [#allocation3], 1 }
 0x3f8   :  { %1536 = vsyncpa [#allocation6], 1 }
 0x3f9   :  { %1537 = vsyncpa [#allocation9], 1 }
 0x3fa   :  { %1538 = vsyncpa [#allocation12], 1 }
 0x3fb   :  { %1539 = vsyncpa [#allocation4], 1 }

</bundles_post_ra>
